<compile_context>
chip_gen: v7x
topology: tpu7x:2x2x1
jax: 0.10.0
libtpu: 0.0.40
codegen_flags: <defaults>
</compile_context>

<pallas_src>
import jax
import jax.numpy as jnp
from jax.experimental import pallas as pl
from jax.experimental.pallas import tpu as pltpu

EPS = 1e-5          # nn.LayerNorm default eps
NEG_INF = -1e9      # masked_fill_ value in the reference


# ----------------------------- in-kernel helpers -----------------------------

def _layernorm(x, gamma, beta):
    mean = jnp.mean(x, axis=-1, keepdims=True)
    var = jnp.mean((x - mean) ** 2, axis=-1, keepdims=True)
    return (x - mean) * jax.lax.rsqrt(var + EPS) * gamma + beta


def _gelu_tanh(x):
    # TODO(synk): tanh-approximate GELU (runs on the EUP); reference nn.GELU()
    # is exact-erf -- numerical delta is well below the bf16 noise floor.
    c = 0.7978845608028654  # sqrt(2/pi)
    return 0.5 * x * (1.0 + jnp.tanh(c * (x + 0.044715 * x * x * x)))


# --------------------------------- kernel ------------------------------------

def bert_kernel(tok_ref, seg_ref, pos_ref, mask_ref,
                eg_ref, eb_ref,
                wqkv_ref, bqkv_ref,
                wo_ref, bo_ref, g1_ref, n1_ref,
                w1_ref, c1_ref, w2_ref, c2_ref, g2_ref, n2_ref,
                wt_ref, bt_ref, wc_ref, bc_ref,
                tok_out_ref, cls_out_ref):
    S, D = pos_ref.shape
    HDo = wo_ref.shape[0]
    Do = w1_ref.shape[1]
    H = HDo // Do
    # NOTE: reference scales by sqrt(query.size(1)) == sqrt(seq_len), not sqrt(d_k).
    inv_scale = 1.0 / (float(S) ** 0.5)

    # ---- joint embedding + LayerNorm (f32 math) ----
    x = (tok_ref[0].astype(jnp.float32) + seg_ref[0].astype(jnp.float32)
         + pos_ref[...])
    x = _layernorm(x, eg_ref[...], eb_ref[...])                      # (S, D) f32
    x_bf = x.astype(jnp.bfloat16)

    # ---- fused, lane-dense QKV projection: one (S,D)x(D,3*H*Do) matmul ----
    qkv = jnp.dot(x_bf, wqkv_ref[...],
                  preferred_element_type=jnp.float32) + bqkv_ref[...]
    q = qkv[:, :HDo].astype(jnp.bfloat16)
    k = qkv[:, HDo:2 * HDo].astype(jnp.bfloat16)
    v = qkv[:, 2 * HDo:].astype(jnp.bfloat16)

    mask_bool = mask_ref[0] > 0.0            # hoisted out of the head loop
    wo = wo_ref[...]                         # (H*Do, D) bf16, loaded once

    # ---- attention heads (static unrolled; output projection accumulated,
    #      so no concat / transpose) ----
    attn_out = jnp.zeros((S, D), jnp.float32)
    for h in range(H):
        lo, hi = h * Do, (h + 1) * Do
        qh, kh, vh = q[:, lo:hi], k[:, lo:hi], v[:, lo:hi]
        # q @ k.T without materializing the transpose (contract Do of both)
        s = jax.lax.dot_general(qh, kh, (((1,), (1,)), ((), ())),
                                preferred_element_type=jnp.float32) * inv_scale
        s = jnp.where(mask_bool, NEG_INF, s)
        s = s - jnp.max(s, axis=-1, keepdims=True)
        p = jnp.exp(s)
        attn = p * pl.reciprocal(jnp.sum(p, axis=-1, keepdims=True), approx=True)
        ctx = jnp.dot(attn.astype(jnp.bfloat16), vh,
                      preferred_element_type=jnp.float32)            # (S, Do)
        attn_out = attn_out + jnp.dot(ctx.astype(jnp.bfloat16), wo[lo:hi, :],
                                      preferred_element_type=jnp.float32)
    attn_out = attn_out + bo_ref[...]
    attn_out = _layernorm(attn_out, g1_ref[...], n1_ref[...])        # MHA norm

    # ---- feedforward: Linear -> Dropout -> GELU -> Linear -> Dropout ----
    # TODO(synk): nn.Dropout implemented as identity (eval-mode semantics).
    h1 = jnp.dot(attn_out.astype(jnp.bfloat16), w1_ref[...],
                 preferred_element_type=jnp.float32) + c1_ref[...]
    h1 = _gelu_tanh(h1)
    h2 = jnp.dot(h1.astype(jnp.bfloat16), w2_ref[...],
                 preferred_element_type=jnp.float32) + c2_ref[...]
    enc = _layernorm(h2, g2_ref[...], n2_ref[...])                   # encoder norm
    e_bf = enc.astype(jnp.bfloat16)

    # ---- token-prediction head + log_softmax (vocab lane-padded to 128k;
    #      padded columns carry bias = -1e9 so they do not perturb the lse) ----
    logits = jnp.dot(e_bf, wt_ref[...],
                     preferred_element_type=jnp.float32) + bt_ref[...]   # (S, Vp)
    m = jnp.max(logits, axis=-1, keepdims=True)
    lse = m + jnp.log(jnp.sum(jnp.exp(logits - m), axis=-1, keepdims=True))
    tok_out_ref[0] = logits - lse

    # ---- classification head on token 0 (output lane-padded to 128) ----
    first = e_bf[0:1, :]                                             # (1, D)
    cls_out_ref[0] = jnp.dot(first, wc_ref[...],
                             preferred_element_type=jnp.float32) + bc_ref[...]


# ------------------------------ host-side glue --------------------------------

def make_positional(S, D):
    d = 2.0 * jnp.arange(D, dtype=jnp.float32) / D
    p = jnp.arange(S, dtype=jnp.float32)[:, None] / (10000.0 ** d)[None, :]
    return jnp.where(jnp.arange(D)[None, :] % 2 == 0,
                     jnp.sin(p), jnp.cos(p)).astype(jnp.float32)      # (S, D)


def prepare_params(params, S):
    """One-time repack: fuse QKV, pad heads lane-dense, cast weights to bf16."""
    D = params["tok_emb"].shape[1]
    H, _, Do = params["wq"].shape
    V = params["w_tok"].shape[1]

    fuse_w = lambda w: jnp.transpose(w, (1, 0, 2)).reshape(D, H * Do)
    fuse_b = lambda b: jnp.transpose(b, (1, 0, 2)).reshape(1, H * Do)
    wqkv = jnp.concatenate([fuse_w(params["wq"]), fuse_w(params["wk"]),
                            fuse_w(params["wv"])], axis=1).astype(jnp.bfloat16)
    bqkv = jnp.concatenate([fuse_b(params["bq"]), fuse_b(params["bk"]),
                            fuse_b(params["bv"])], axis=1)

    Vp = 128 * ((V + 127) // 128)
    w_tok = (jnp.zeros((D, Vp), jnp.float32)
             .at[:, :V].set(params["w_tok"]).astype(jnp.bfloat16))
    b_tok = jnp.full((1, Vp), NEG_INF, jnp.float32).at[:, :V].set(params["b_tok"])
    Cp = 128
    w_cls = (jnp.zeros((D, Cp), jnp.float32)
             .at[:, :2].set(params["w_cls"]).astype(jnp.bfloat16))
    b_cls = jnp.zeros((1, Cp), jnp.float32).at[:, :2].set(params["b_cls"])

    return dict(
        tok_emb=params["tok_emb"].astype(jnp.bfloat16),
        seg_emb=params["seg_emb"].astype(jnp.bfloat16),       # (2, D) table
        pos=make_positional(S, D),
        emb_gamma=params["emb_gamma"], emb_beta=params["emb_beta"],
        wqkv=wqkv, bqkv=bqkv,
        wo=params["wo"].astype(jnp.bfloat16), bo=params["bo"],
        mha_gamma=params["mha_gamma"], mha_beta=params["mha_beta"],
        w1=params["w1"].astype(jnp.bfloat16), b1=params["b1"],
        w2=params["w2"].astype(jnp.bfloat16), b2=params["b2"],
        ff_gamma=params["ff_gamma"], ff_beta=params["ff_beta"],
        w_tok=w_tok, b_tok=b_tok, w_cls=w_cls, b_cls=b_cls,
        vocab=V, vocab_pad=Vp, cls_pad=Cp,
    )


def bert_forward(prep, input_ids, attention_mask):
    B, S = input_ids.shape
    D = prep["tok_emb"].shape[1]
    V, Vp, Cp = prep["vocab"], prep["vocab_pad"], prep["cls_pad"]

    # embedding gathers (plain-JAX glue; data-dependent)
    tok = jnp.take(prep["tok_emb"], input_ids, axis=0)                # (B,S,D) bf16
    seg_ids = jnp.zeros_like(input_ids).at[:, S // 2 + 1:].set(1)
    seg = jnp.take(prep["seg_emb"], seg_ids, axis=0)                  # (B,S,D) bf16
    mask = attention_mask.astype(jnp.float32)                        # (B,S,S)

    full = lambda shape: pl.BlockSpec(shape, lambda b: (0,) * len(shape))
    per_b = lambda shape: pl.BlockSpec(
        shape, lambda b: (b,) + (0,) * (len(shape) - 1))

    tok_out, cls_out = pl.pallas_call(
        bert_kernel,
        out_shape=(jax.ShapeDtypeStruct((B, S, Vp), jnp.float32),
                   jax.ShapeDtypeStruct((B, 1, Cp), jnp.float32)),
        grid=(B,),
        in_specs=[
            per_b((1, S, D)),                       # tok emb
            per_b((1, S, D)),                       # seg emb
            full((S, D)),                           # positional table
            per_b((1, S, S)),                       # attention mask
            full((1, D)), full((1, D)),             # embedding LN
            full(prep["wqkv"].shape), full(prep["bqkv"].shape),
            full(prep["wo"].shape), full((1, D)),   # attn out proj
            full((1, D)), full((1, D)),             # MHA LN
            full(prep["w1"].shape), full(prep["b1"].shape),
            full(prep["w2"].shape), full((1, D)),
            full((1, D)), full((1, D)),             # encoder LN
            full((D, Vp)), full((1, Vp)),           # token head (padded)
            full((D, Cp)), full((1, Cp)),           # cls head (padded)
        ],
        out_specs=[per_b((1, S, Vp)), per_b((1, 1, Cp))],
        compiler_params=pltpu.CompilerParams(
            dimension_semantics=("parallel",),
            vmem_limit_bytes=32 * 1024 * 1024),
    )(tok, seg, prep["pos"], mask,
      prep["emb_gamma"], prep["emb_beta"],
      prep["wqkv"], prep["bqkv"],
      prep["wo"], prep["bo"], prep["mha_gamma"], prep["mha_beta"],
      prep["w1"], prep["b1"], prep["w2"], prep["b2"],
      prep["ff_gamma"], prep["ff_beta"],
      prep["w_tok"], prep["b_tok"], prep["w_cls"], prep["b_cls"])

    return tok_out[:, :, :V], cls_out[:, 0, :2]


def init_params(key, vocab, dim_inp, dim_out, heads):
    ks = jax.random.split(key, 18)
    nrm = lambda k, shape, s=0.02: (s * jax.random.normal(k, shape)).astype(jnp.float32)
    return dict(
        tok_emb=nrm(ks[0], (vocab, dim_inp), 1.0),
        seg_emb=nrm(ks[1], (2, dim_inp), 1.0),      # only segment ids 0/1 are used
        emb_gamma=jnp.ones((1, dim_inp), jnp.float32),
        emb_beta=jnp.zeros((1, dim_inp), jnp.float32),
        wq=nrm(ks[2], (heads, dim_inp, dim_out)),
        bq=nrm(ks[3], (heads, 1, dim_out)),
        wk=nrm(ks[4], (heads, dim_inp, dim_out)),
        bk=nrm(ks[5], (heads, 1, dim_out)),
        wv=nrm(ks[6], (heads, dim_inp, dim_out)),
        bv=nrm(ks[7], (heads, 1, dim_out)),
        wo=nrm(ks[8], (heads * dim_out, dim_inp)),
        bo=nrm(ks[9], (1, dim_inp)),
        mha_gamma=jnp.ones((1, dim_inp), jnp.float32),
        mha_beta=jnp.zeros((1, dim_inp), jnp.float32),
        w1=nrm(ks[10], (dim_inp, dim_out)),
        b1=nrm(ks[11], (1, dim_out)),
        w2=nrm(ks[12], (dim_out, dim_inp)),
        b2=nrm(ks[13], (1, dim_inp)),
        ff_gamma=jnp.ones((1, dim_inp), jnp.float32),
        ff_beta=jnp.zeros((1, dim_inp), jnp.float32),
        w_tok=nrm(ks[14], (dim_inp, vocab)),
        b_tok=nrm(ks[15], (1, vocab)),
        w_cls=nrm(ks[16], (dim_inp, 2)),
        b_cls=nrm(ks[17], (1, 2)),
    )


if __name__ == "__main__":
    B, S = 2, 8
    VOCAB, DIM_INP, DIM_OUT, HEADS = 64, 32, 32, 4

    key = jax.random.PRNGKey(0)
    kp, kid = jax.random.split(key)
    params = init_params(kp, VOCAB, DIM_INP, DIM_OUT, HEADS)
    prep = prepare_params(params, S)      # one-time repack (hoisted constants)

    input_ids = jax.random.randint(kid, (B, S), 0, VOCAB, dtype=jnp.int32)
    # mask == 1.0 at padded key positions (last 2 tokens of each sequence)
    key_pad = jnp.zeros((B, S), jnp.float32).at[:, S - 2:].set(1.0)
    attention_mask = jnp.broadcast_to(key_pad[:, None, :], (B, S, S)).astype(jnp.float32)

    log_probs, cls_logits = bert_forward(prep, input_ids, attention_mask)
    jax.block_until_ready((log_probs, cls_logits))

    assert log_probs.shape == (B, S, VOCAB)
    assert cls_logits.shape == (B, 2)
    assert bool(jnp.isfinite(log_probs).all()) and bool(jnp.isfinite(cls_logits).all())
    # log_softmax rows must sum to ~1 in prob space
    assert bool(jnp.allclose(jnp.sum(jnp.exp(log_probs), axis=-1), 1.0, atol=1e-3))
    print("KERNEL_OK")
</pallas_src>

<mosaic_0001>
module attributes {stable_mosaic.version = 11 : i64} {
  func.func @bert_kernel(%arg0: i32, %arg1: memref<1x8x32xbf16, #tpu.memory_space<vmem>>, %arg2: memref<1x8x32xbf16, #tpu.memory_space<vmem>>, %arg3: memref<8x32xf32, #tpu.memory_space<vmem>>, %arg4: memref<1x8x8xf32, #tpu.memory_space<vmem>>, %arg5: memref<1x32xf32, #tpu.memory_space<vmem>>, %arg6: memref<1x32xf32, #tpu.memory_space<vmem>>, %arg7: memref<32x384xbf16, #tpu.memory_space<vmem>>, %arg8: memref<1x384xf32, #tpu.memory_space<vmem>>, %arg9: memref<128x32xbf16, #tpu.memory_space<vmem>>, %arg10: memref<1x32xf32, #tpu.memory_space<vmem>>, %arg11: memref<1x32xf32, #tpu.memory_space<vmem>>, %arg12: memref<1x32xf32, #tpu.memory_space<vmem>>, %arg13: memref<32x32xbf16, #tpu.memory_space<vmem>>, %arg14: memref<1x32xf32, #tpu.memory_space<vmem>>, %arg15: memref<32x32xbf16, #tpu.memory_space<vmem>>, %arg16: memref<1x32xf32, #tpu.memory_space<vmem>>, %arg17: memref<1x32xf32, #tpu.memory_space<vmem>>, %arg18: memref<1x32xf32, #tpu.memory_space<vmem>>, %arg19: memref<32x128xbf16, #tpu.memory_space<vmem>>, %arg20: memref<1x128xf32, #tpu.memory_space<vmem>>, %arg21: memref<32x128xbf16, #tpu.memory_space<vmem>>, %arg22: memref<1x128xf32, #tpu.memory_space<vmem>>, %arg23: memref<1x8x128xf32, #tpu.memory_space<vmem>>, %arg24: memref<1x1x128xf32, #tpu.memory_space<vmem>>) attributes {dimension_semantics = [#tpu.dimension_semantics<parallel>], iteration_bounds = array<i64: 2>, scalar_prefetch = 0 : i64, scratch_operands = 0 : i64, tpu.core_type = #tpu.core_type<tc>, window_params = [{transform_indices = @transform_0, window_bounds = array<i64: 1, 8, 32>}, {transform_indices = @transform_1, window_bounds = array<i64: 1, 8, 32>}, {pipeline_mode = #tpu.pipeline_mode<synchronous>, transform_indices = @transform_2, window_bounds = array<i64: 8, 32>}, {transform_indices = @transform_3, window_bounds = array<i64: 1, 8, 8>}, {pipeline_mode = #tpu.pipeline_mode<synchronous>, transform_indices = @transform_4, window_bounds = array<i64: 1, 32>}, {pipeline_mode = #tpu.pipeline_mode<synchronous>, transform_indices = @transform_5, window_bounds = array<i64: 1, 32>}, {pipeline_mode = #tpu.pipeline_mode<synchronous>, transform_indices = @transform_6, window_bounds = array<i64: 32, 384>}, {pipeline_mode = #tpu.pipeline_mode<synchronous>, transform_indices = @transform_7, window_bounds = array<i64: 1, 384>}, {pipeline_mode = #tpu.pipeline_mode<synchronous>, transform_indices = @transform_8, window_bounds = array<i64: 128, 32>}, {pipeline_mode = #tpu.pipeline_mode<synchronous>, transform_indices = @transform_9, window_bounds = array<i64: 1, 32>}, {pipeline_mode = #tpu.pipeline_mode<synchronous>, transform_indices = @transform_10, window_bounds = array<i64: 1, 32>}, {pipeline_mode = #tpu.pipeline_mode<synchronous>, transform_indices = @transform_11, window_bounds = array<i64: 1, 32>}, {pipeline_mode = #tpu.pipeline_mode<synchronous>, transform_indices = @transform_12, window_bounds = array<i64: 32, 32>}, {pipeline_mode = #tpu.pipeline_mode<synchronous>, transform_indices = @transform_13, window_bounds = array<i64: 1, 32>}, {pipeline_mode = #tpu.pipeline_mode<synchronous>, transform_indices = @transform_14, window_bounds = array<i64: 32, 32>}, {pipeline_mode = #tpu.pipeline_mode<synchronous>, transform_indices = @transform_15, window_bounds = array<i64: 1, 32>}, {pipeline_mode = #tpu.pipeline_mode<synchronous>, transform_indices = @transform_16, window_bounds = array<i64: 1, 32>}, {pipeline_mode = #tpu.pipeline_mode<synchronous>, transform_indices = @transform_17, window_bounds = array<i64: 1, 32>}, {pipeline_mode = #tpu.pipeline_mode<synchronous>, transform_indices = @transform_18, window_bounds = array<i64: 32, 128>}, {pipeline_mode = #tpu.pipeline_mode<synchronous>, transform_indices = @transform_19, window_bounds = array<i64: 1, 128>}, {pipeline_mode = #tpu.pipeline_mode<synchronous>, transform_indices = @transform_20, window_bounds = array<i64: 32, 128>}, {pipeline_mode = #tpu.pipeline_mode<synchronous>, transform_indices = @transform_21, window_bounds = array<i64: 1, 128>}, {transform_indices = @transform_22, window_bounds = array<i64: 1, 8, 128>}, {transform_indices = @transform_23, window_bounds = array<i64: 1, 1, 128>}]} {
    %c0 = arith.constant 0 : index
    %c0_0 = arith.constant 0 : index
    %c0_1 = arith.constant 0 : index
    %0 = vector.load %arg1[%c0, %c0_0, %c0_1] : memref<1x8x32xbf16, #tpu.memory_space<vmem>>, vector<1x8x32xbf16>
    %1 = vector.shape_cast %0 : vector<1x8x32xbf16> to vector<8x32xbf16>
    %2 = arith.extf %1 : vector<8x32xbf16> to vector<8x32xf32>
    %c0_2 = arith.constant 0 : index
    %c0_3 = arith.constant 0 : index
    %c0_4 = arith.constant 0 : index
    %3 = vector.load %arg2[%c0_2, %c0_3, %c0_4] : memref<1x8x32xbf16, #tpu.memory_space<vmem>>, vector<1x8x32xbf16>
    %4 = vector.shape_cast %3 : vector<1x8x32xbf16> to vector<8x32xbf16>
    %5 = arith.extf %4 : vector<8x32xbf16> to vector<8x32xf32>
    %6 = arith.addf %2, %5 : vector<8x32xf32>
    %c0_5 = arith.constant 0 : index
    %c0_6 = arith.constant 0 : index
    %7 = vector.load %arg3[%c0_5, %c0_6] : memref<8x32xf32, #tpu.memory_space<vmem>>, vector<8x32xf32>
    %8 = arith.addf %6, %7 : vector<8x32xf32>
    %c0_7 = arith.constant 0 : index
    %c0_8 = arith.constant 0 : index
    %9 = vector.load %arg5[%c0_7, %c0_8] : memref<1x32xf32, #tpu.memory_space<vmem>>, vector<1x32xf32>
    %c0_9 = arith.constant 0 : index
    %c0_10 = arith.constant 0 : index
    %10 = vector.load %arg6[%c0_9, %c0_10] : memref<1x32xf32, #tpu.memory_space<vmem>>, vector<1x32xf32>
    %cst = arith.constant dense<0.000000e+00> : vector<8xf32>
    %11 = vector.multi_reduction <add>, %8, %cst [1] : vector<8x32xf32> to vector<8xf32>
    %12 = vector.shape_cast %11 : vector<8xf32> to vector<8x1xf32>
    %cst_11 = arith.constant 3.200000e+01 : f32
    %13 = vector.broadcast %cst_11 : f32 to vector<8x1xf32>
    %14 = arith.divf %12, %13 : vector<8x1xf32>
    %15 = vector.broadcast %14 : vector<8x1xf32> to vector<8x32xf32>
    %16 = arith.subf %8, %15 : vector<8x32xf32>
    %17 = arith.mulf %16, %16 : vector<8x32xf32>
    %cst_12 = arith.constant dense<0.000000e+00> : vector<8xf32>
    %18 = vector.multi_reduction <add>, %17, %cst_12 [1] : vector<8x32xf32> to vector<8xf32>
    %19 = vector.shape_cast %18 : vector<8xf32> to vector<8x1xf32>
    %cst_13 = arith.constant 3.200000e+01 : f32
    %20 = vector.broadcast %cst_13 : f32 to vector<8x1xf32>
    %21 = arith.divf %19, %20 : vector<8x1xf32>
    %22 = vector.broadcast %14 : vector<8x1xf32> to vector<8x32xf32>
    %23 = arith.subf %8, %22 : vector<8x32xf32>
    %cst_14 = arith.constant 9.99999974E-6 : f32
    %24 = vector.broadcast %cst_14 : f32 to vector<8x1xf32>
    %25 = arith.addf %21, %24 : vector<8x1xf32>
    %26 = math.rsqrt %25 : vector<8x1xf32>
    %27 = vector.broadcast %26 : vector<8x1xf32> to vector<8x32xf32>
    %28 = arith.mulf %23, %27 : vector<8x32xf32>
    %29 = vector.broadcast %9 : vector<1x32xf32> to vector<8x32xf32>
    %30 = arith.mulf %28, %29 : vector<8x32xf32>
    %31 = vector.broadcast %10 : vector<1x32xf32> to vector<8x32xf32>
    %32 = arith.addf %30, %31 : vector<8x32xf32>
    %33 = arith.truncf %32 : vector<8x32xf32> to vector<8x32xbf16>
    %c0_15 = arith.constant 0 : index
    %c0_16 = arith.constant 0 : index
    %34 = vector.load %arg7[%c0_15, %c0_16] : memref<32x384xbf16, #tpu.memory_space<vmem>>, vector<32x384xbf16>
    %cst_17 = arith.constant dense<0.000000e+00> : vector<8x384xf32>
    %35 = tpu.matmul %33, %34, %cst_17 {dimension_numbers = #tpu.dot_dimension_numbers<[1], [0], [0], [1], [0, 0, 1, 1], [], []>} : vector<8x32xbf16>, vector<32x384xbf16>, vector<8x384xf32> -> vector<8x384xf32>
    %c0_18 = arith.constant 0 : index
    %c0_19 = arith.constant 0 : index
    %36 = vector.load %arg8[%c0_18, %c0_19] : memref<1x384xf32, #tpu.memory_space<vmem>>, vector<1x384xf32>
    %37 = vector.broadcast %36 : vector<1x384xf32> to vector<8x384xf32>
    %38 = arith.addf %35, %37 : vector<8x384xf32>
    %39 = vector.extract_strided_slice %38 {offsets = [0, 0], sizes = [8, 128], strides = [1, 1]} : vector<8x384xf32> to vector<8x128xf32>
    %40 = arith.truncf %39 : vector<8x128xf32> to vector<8x128xbf16>
    %41 = vector.extract_strided_slice %38 {offsets = [0, 128], sizes = [8, 128], strides = [1, 1]} : vector<8x384xf32> to vector<8x128xf32>
    %42 = arith.truncf %41 : vector<8x128xf32> to vector<8x128xbf16>
    %43 = vector.extract_strided_slice %38 {offsets = [0, 256], sizes = [8, 128], strides = [1, 1]} : vector<8x384xf32> to vector<8x128xf32>
    %44 = arith.truncf %43 : vector<8x128xf32> to vector<8x128xbf16>
    %c0_20 = arith.constant 0 : index
    %c0_21 = arith.constant 0 : index
    %c0_22 = arith.constant 0 : index
    %45 = vector.load %arg4[%c0_20, %c0_21, %c0_22] : memref<1x8x8xf32, #tpu.memory_space<vmem>>, vector<1x8x8xf32>
    %46 = vector.shape_cast %45 : vector<1x8x8xf32> to vector<8x8xf32>
    %cst_23 = arith.constant 0.000000e+00 : f32
    %47 = vector.broadcast %cst_23 : f32 to vector<8x8xf32>
    %48 = arith.cmpf ogt, %46, %47 : vector<8x8xf32>
    %c0_24 = arith.constant 0 : index
    %c0_25 = arith.constant 0 : index
    %49 = vector.load %arg9[%c0_24, %c0_25] : memref<128x32xbf16, #tpu.memory_space<vmem>>, vector<128x32xbf16>
    %cst_26 = arith.constant 0.000000e+00 : f32
    %50 = vector.broadcast %cst_26 : f32 to vector<8x32xf32>
    %51 = vector.extract_strided_slice %40 {offsets = [0, 0], sizes = [8, 32], strides = [1, 1]} : vector<8x128xbf16> to vector<8x32xbf16>
    %52 = vector.extract_strided_slice %42 {offsets = [0, 0], sizes = [8, 32], strides = [1, 1]} : vector<8x128xbf16> to vector<8x32xbf16>
    %53 = vector.extract_strided_slice %44 {offsets = [0, 0], sizes = [8, 32], strides = [1, 1]} : vector<8x128xbf16> to vector<8x32xbf16>
    %cst_27 = arith.constant dense<0.000000e+00> : vector<8x8xf32>
    %54 = tpu.matmul %51, %52, %cst_27 {dimension_numbers = #tpu.dot_dimension_numbers<[1], [1], [0], [0], [0, 0, 1, 0], [], []>} : vector<8x32xbf16>, vector<8x32xbf16>, vector<8x8xf32> -> vector<8x8xf32>
    %cst_28 = arith.constant 0.353553385 : f32
    %55 = vector.broadcast %cst_28 : f32 to vector<8x8xf32>
    %56 = arith.mulf %54, %55 : vector<8x8xf32>
    %cst_29 = arith.constant -1.000000e+09 : f32
    %57 = vector.broadcast %cst_29 : f32 to vector<8x8xf32>
    %58 = arith.select %48, %57, %56 : vector<8x8xi1>, vector<8x8xf32>
    %cst_30 = arith.constant dense<0xFF800000> : vector<8xf32>
    %59 = vector.multi_reduction <maximumf>, %58, %cst_30 [1] : vector<8x8xf32> to vector<8xf32>
    %60 = vector.shape_cast %59 : vector<8xf32> to vector<8x1xf32>
    %61 = vector.broadcast %60 : vector<8x1xf32> to vector<8x8xf32>
    %62 = arith.subf %58, %61 : vector<8x8xf32>
    %63 = math.exp %62 : vector<8x8xf32>
    %cst_31 = arith.constant dense<0.000000e+00> : vector<8xf32>
    %64 = vector.multi_reduction <add>, %63, %cst_31 [1] : vector<8x8xf32> to vector<8xf32>
    %65 = vector.shape_cast %64 : vector<8xf32> to vector<8x1xf32>
    %66 = tpu.reciprocal %65 {approx = true} : vector<8x1xf32> -> vector<8x1xf32>
    %67 = vector.broadcast %66 : vector<8x1xf32> to vector<8x8xf32>
    %68 = arith.mulf %63, %67 : vector<8x8xf32>
    %69 = arith.truncf %68 : vector<8x8xf32> to vector<8x8xbf16>
    %cst_32 = arith.constant dense<0.000000e+00> : vector<8x32xf32>
    %70 = tpu.matmul %69, %53, %cst_32 {dimension_numbers = #tpu.dot_dimension_numbers<[1], [0], [0], [1], [0, 0, 1, 1], [], []>} : vector<8x8xbf16>, vector<8x32xbf16>, vector<8x32xf32> -> vector<8x32xf32>
    %71 = arith.truncf %70 : vector<8x32xf32> to vector<8x32xbf16>
    %72 = vector.extract_strided_slice %49 {offsets = [0, 0], sizes = [32, 32], strides = [1, 1]} : vector<128x32xbf16> to vector<32x32xbf16>
    %cst_33 = arith.constant dense<0.000000e+00> : vector<8x32xf32>
    %73 = tpu.matmul %71, %72, %cst_33 {dimension_numbers = #tpu.dot_dimension_numbers<[1], [0], [0], [1], [0, 0, 1, 1], [], []>} : vector<8x32xbf16>, vector<32x32xbf16>, vector<8x32xf32> -> vector<8x32xf32>
    %74 = arith.addf %50, %73 : vector<8x32xf32>
    %75 = vector.extract_strided_slice %40 {offsets = [0, 32], sizes = [8, 32], strides = [1, 1]} : vector<8x128xbf16> to vector<8x32xbf16>
    %76 = vector.extract_strided_slice %42 {offsets = [0, 32], sizes = [8, 32], strides = [1, 1]} : vector<8x128xbf16> to vector<8x32xbf16>
    %77 = vector.extract_strided_slice %44 {offsets = [0, 32], sizes = [8, 32], strides = [1, 1]} : vector<8x128xbf16> to vector<8x32xbf16>
    %cst_34 = arith.constant dense<0.000000e+00> : vector<8x8xf32>
    %78 = tpu.matmul %75, %76, %cst_34 {dimension_numbers = #tpu.dot_dimension_numbers<[1], [1], [0], [0], [0, 0, 1, 0], [], []>} : vector<8x32xbf16>, vector<8x32xbf16>, vector<8x8xf32> -> vector<8x8xf32>
    %cst_35 = arith.constant 0.353553385 : f32
    %79 = vector.broadcast %cst_35 : f32 to vector<8x8xf32>
    %80 = arith.mulf %78, %79 : vector<8x8xf32>
    %cst_36 = arith.constant -1.000000e+09 : f32
    %81 = vector.broadcast %cst_36 : f32 to vector<8x8xf32>
    %82 = arith.select %48, %81, %80 : vector<8x8xi1>, vector<8x8xf32>
    %cst_37 = arith.constant dense<0xFF800000> : vector<8xf32>
    %83 = vector.multi_reduction <maximumf>, %82, %cst_37 [1] : vector<8x8xf32> to vector<8xf32>
    %84 = vector.shape_cast %83 : vector<8xf32> to vector<8x1xf32>
    %85 = vector.broadcast %84 : vector<8x1xf32> to vector<8x8xf32>
    %86 = arith.subf %82, %85 : vector<8x8xf32>
    %87 = math.exp %86 : vector<8x8xf32>
    %cst_38 = arith.constant dense<0.000000e+00> : vector<8xf32>
    %88 = vector.multi_reduction <add>, %87, %cst_38 [1] : vector<8x8xf32> to vector<8xf32>
    %89 = vector.shape_cast %88 : vector<8xf32> to vector<8x1xf32>
    %90 = tpu.reciprocal %89 {approx = true} : vector<8x1xf32> -> vector<8x1xf32>
    %91 = vector.broadcast %90 : vector<8x1xf32> to vector<8x8xf32>
    %92 = arith.mulf %87, %91 : vector<8x8xf32>
    %93 = arith.truncf %92 : vector<8x8xf32> to vector<8x8xbf16>
    %cst_39 = arith.constant dense<0.000000e+00> : vector<8x32xf32>
    %94 = tpu.matmul %93, %77, %cst_39 {dimension_numbers = #tpu.dot_dimension_numbers<[1], [0], [0], [1], [0, 0, 1, 1], [], []>} : vector<8x8xbf16>, vector<8x32xbf16>, vector<8x32xf32> -> vector<8x32xf32>
    %95 = arith.truncf %94 : vector<8x32xf32> to vector<8x32xbf16>
    %96 = vector.extract_strided_slice %49 {offsets = [32, 0], sizes = [32, 32], strides = [1, 1]} : vector<128x32xbf16> to vector<32x32xbf16>
    %cst_40 = arith.constant dense<0.000000e+00> : vector<8x32xf32>
    %97 = tpu.matmul %95, %96, %cst_40 {dimension_numbers = #tpu.dot_dimension_numbers<[1], [0], [0], [1], [0, 0, 1, 1], [], []>} : vector<8x32xbf16>, vector<32x32xbf16>, vector<8x32xf32> -> vector<8x32xf32>
    %98 = arith.addf %74, %97 : vector<8x32xf32>
    %99 = vector.extract_strided_slice %40 {offsets = [0, 64], sizes = [8, 32], strides = [1, 1]} : vector<8x128xbf16> to vector<8x32xbf16>
    %100 = vector.extract_strided_slice %42 {offsets = [0, 64], sizes = [8, 32], strides = [1, 1]} : vector<8x128xbf16> to vector<8x32xbf16>
    %101 = vector.extract_strided_slice %44 {offsets = [0, 64], sizes = [8, 32], strides = [1, 1]} : vector<8x128xbf16> to vector<8x32xbf16>
    %cst_41 = arith.constant dense<0.000000e+00> : vector<8x8xf32>
    %102 = tpu.matmul %99, %100, %cst_41 {dimension_numbers = #tpu.dot_dimension_numbers<[1], [1], [0], [0], [0, 0, 1, 0], [], []>} : vector<8x32xbf16>, vector<8x32xbf16>, vector<8x8xf32> -> vector<8x8xf32>
    %cst_42 = arith.constant 0.353553385 : f32
    %103 = vector.broadcast %cst_42 : f32 to vector<8x8xf32>
    %104 = arith.mulf %102, %103 : vector<8x8xf32>
    %cst_43 = arith.constant -1.000000e+09 : f32
    %105 = vector.broadcast %cst_43 : f32 to vector<8x8xf32>
    %106 = arith.select %48, %105, %104 : vector<8x8xi1>, vector<8x8xf32>
    %cst_44 = arith.constant dense<0xFF800000> : vector<8xf32>
    %107 = vector.multi_reduction <maximumf>, %106, %cst_44 [1] : vector<8x8xf32> to vector<8xf32>
    %108 = vector.shape_cast %107 : vector<8xf32> to vector<8x1xf32>
    %109 = vector.broadcast %108 : vector<8x1xf32> to vector<8x8xf32>
    %110 = arith.subf %106, %109 : vector<8x8xf32>
    %111 = math.exp %110 : vector<8x8xf32>
    %cst_45 = arith.constant dense<0.000000e+00> : vector<8xf32>
    %112 = vector.multi_reduction <add>, %111, %cst_45 [1] : vector<8x8xf32> to vector<8xf32>
    %113 = vector.shape_cast %112 : vector<8xf32> to vector<8x1xf32>
    %114 = tpu.reciprocal %113 {approx = true} : vector<8x1xf32> -> vector<8x1xf32>
    %115 = vector.broadcast %114 : vector<8x1xf32> to vector<8x8xf32>
    %116 = arith.mulf %111, %115 : vector<8x8xf32>
    %117 = arith.truncf %116 : vector<8x8xf32> to vector<8x8xbf16>
    %cst_46 = arith.constant dense<0.000000e+00> : vector<8x32xf32>
    %118 = tpu.matmul %117, %101, %cst_46 {dimension_numbers = #tpu.dot_dimension_numbers<[1], [0], [0], [1], [0, 0, 1, 1], [], []>} : vector<8x8xbf16>, vector<8x32xbf16>, vector<8x32xf32> -> vector<8x32xf32>
    %119 = arith.truncf %118 : vector<8x32xf32> to vector<8x32xbf16>
    %120 = vector.extract_strided_slice %49 {offsets = [64, 0], sizes = [32, 32], strides = [1, 1]} : vector<128x32xbf16> to vector<32x32xbf16>
    %cst_47 = arith.constant dense<0.000000e+00> : vector<8x32xf32>
    %121 = tpu.matmul %119, %120, %cst_47 {dimension_numbers = #tpu.dot_dimension_numbers<[1], [0], [0], [1], [0, 0, 1, 1], [], []>} : vector<8x32xbf16>, vector<32x32xbf16>, vector<8x32xf32> -> vector<8x32xf32>
    %122 = arith.addf %98, %121 : vector<8x32xf32>
    %123 = vector.extract_strided_slice %40 {offsets = [0, 96], sizes = [8, 32], strides = [1, 1]} : vector<8x128xbf16> to vector<8x32xbf16>
    %124 = vector.extract_strided_slice %42 {offsets = [0, 96], sizes = [8, 32], strides = [1, 1]} : vector<8x128xbf16> to vector<8x32xbf16>
    %125 = vector.extract_strided_slice %44 {offsets = [0, 96], sizes = [8, 32], strides = [1, 1]} : vector<8x128xbf16> to vector<8x32xbf16>
    %cst_48 = arith.constant dense<0.000000e+00> : vector<8x8xf32>
    %126 = tpu.matmul %123, %124, %cst_48 {dimension_numbers = #tpu.dot_dimension_numbers<[1], [1], [0], [0], [0, 0, 1, 0], [], []>} : vector<8x32xbf16>, vector<8x32xbf16>, vector<8x8xf32> -> vector<8x8xf32>
    %cst_49 = arith.constant 0.353553385 : f32
    %127 = vector.broadcast %cst_49 : f32 to vector<8x8xf32>
    %128 = arith.mulf %126, %127 : vector<8x8xf32>
    %cst_50 = arith.constant -1.000000e+09 : f32
    %129 = vector.broadcast %cst_50 : f32 to vector<8x8xf32>
    %130 = arith.select %48, %129, %128 : vector<8x8xi1>, vector<8x8xf32>
    %cst_51 = arith.constant dense<0xFF800000> : vector<8xf32>
    %131 = vector.multi_reduction <maximumf>, %130, %cst_51 [1] : vector<8x8xf32> to vector<8xf32>
    %132 = vector.shape_cast %131 : vector<8xf32> to vector<8x1xf32>
    %133 = vector.broadcast %132 : vector<8x1xf32> to vector<8x8xf32>
    %134 = arith.subf %130, %133 : vector<8x8xf32>
    %135 = math.exp %134 : vector<8x8xf32>
    %cst_52 = arith.constant dense<0.000000e+00> : vector<8xf32>
    %136 = vector.multi_reduction <add>, %135, %cst_52 [1] : vector<8x8xf32> to vector<8xf32>
    %137 = vector.shape_cast %136 : vector<8xf32> to vector<8x1xf32>
    %138 = tpu.reciprocal %137 {approx = true} : vector<8x1xf32> -> vector<8x1xf32>
    %139 = vector.broadcast %138 : vector<8x1xf32> to vector<8x8xf32>
    %140 = arith.mulf %135, %139 : vector<8x8xf32>
    %141 = arith.truncf %140 : vector<8x8xf32> to vector<8x8xbf16>
    %cst_53 = arith.constant dense<0.000000e+00> : vector<8x32xf32>
    %142 = tpu.matmul %141, %125, %cst_53 {dimension_numbers = #tpu.dot_dimension_numbers<[1], [0], [0], [1], [0, 0, 1, 1], [], []>} : vector<8x8xbf16>, vector<8x32xbf16>, vector<8x32xf32> -> vector<8x32xf32>
    %143 = arith.truncf %142 : vector<8x32xf32> to vector<8x32xbf16>
    %144 = vector.extract_strided_slice %49 {offsets = [96, 0], sizes = [32, 32], strides = [1, 1]} : vector<128x32xbf16> to vector<32x32xbf16>
    %cst_54 = arith.constant dense<0.000000e+00> : vector<8x32xf32>
    %145 = tpu.matmul %143, %144, %cst_54 {dimension_numbers = #tpu.dot_dimension_numbers<[1], [0], [0], [1], [0, 0, 1, 1], [], []>} : vector<8x32xbf16>, vector<32x32xbf16>, vector<8x32xf32> -> vector<8x32xf32>
    %146 = arith.addf %122, %145 : vector<8x32xf32>
    %c0_55 = arith.constant 0 : index
    %c0_56 = arith.constant 0 : index
    %147 = vector.load %arg10[%c0_55, %c0_56] : memref<1x32xf32, #tpu.memory_space<vmem>>, vector<1x32xf32>
    %148 = vector.broadcast %147 : vector<1x32xf32> to vector<8x32xf32>
    %149 = arith.addf %146, %148 : vector<8x32xf32>
    %c0_57 = arith.constant 0 : index
    %c0_58 = arith.constant 0 : index
    %150 = vector.load %arg11[%c0_57, %c0_58] : memref<1x32xf32, #tpu.memory_space<vmem>>, vector<1x32xf32>
    %c0_59 = arith.constant 0 : index
    %c0_60 = arith.constant 0 : index
    %151 = vector.load %arg12[%c0_59, %c0_60] : memref<1x32xf32, #tpu.memory_space<vmem>>, vector<1x32xf32>
    %cst_61 = arith.constant dense<0.000000e+00> : vector<8xf32>
    %152 = vector.multi_reduction <add>, %149, %cst_61 [1] : vector<8x32xf32> to vector<8xf32>
    %153 = vector.shape_cast %152 : vector<8xf32> to vector<8x1xf32>
    %cst_62 = arith.constant 3.200000e+01 : f32
    %154 = vector.broadcast %cst_62 : f32 to vector<8x1xf32>
    %155 = arith.divf %153, %154 : vector<8x1xf32>
    %156 = vector.broadcast %155 : vector<8x1xf32> to vector<8x32xf32>
    %157 = arith.subf %149, %156 : vector<8x32xf32>
    %158 = arith.mulf %157, %157 : vector<8x32xf32>
    %cst_63 = arith.constant dense<0.000000e+00> : vector<8xf32>
    %159 = vector.multi_reduction <add>, %158, %cst_63 [1] : vector<8x32xf32> to vector<8xf32>
    %160 = vector.shape_cast %159 : vector<8xf32> to vector<8x1xf32>
    %cst_64 = arith.constant 3.200000e+01 : f32
    %161 = vector.broadcast %cst_64 : f32 to vector<8x1xf32>
    %162 = arith.divf %160, %161 : vector<8x1xf32>
    %163 = vector.broadcast %155 : vector<8x1xf32> to vector<8x32xf32>
    %164 = arith.subf %149, %163 : vector<8x32xf32>
    %cst_65 = arith.constant 9.99999974E-6 : f32
    %165 = vector.broadcast %cst_65 : f32 to vector<8x1xf32>
    %166 = arith.addf %162, %165 : vector<8x1xf32>
    %167 = math.rsqrt %166 : vector<8x1xf32>
    %168 = vector.broadcast %167 : vector<8x1xf32> to vector<8x32xf32>
    %169 = arith.mulf %164, %168 : vector<8x32xf32>
    %170 = vector.broadcast %150 : vector<1x32xf32> to vector<8x32xf32>
    %171 = arith.mulf %169, %170 : vector<8x32xf32>
    %172 = vector.broadcast %151 : vector<1x32xf32> to vector<8x32xf32>
    %173 = arith.addf %171, %172 : vector<8x32xf32>
    %174 = arith.truncf %173 : vector<8x32xf32> to vector<8x32xbf16>
    %c0_66 = arith.constant 0 : index
    %c0_67 = arith.constant 0 : index
    %175 = vector.load %arg13[%c0_66, %c0_67] : memref<32x32xbf16, #tpu.memory_space<vmem>>, vector<32x32xbf16>
    %cst_68 = arith.constant dense<0.000000e+00> : vector<8x32xf32>
    %176 = tpu.matmul %174, %175, %cst_68 {dimension_numbers = #tpu.dot_dimension_numbers<[1], [0], [0], [1], [0, 0, 1, 1], [], []>} : vector<8x32xbf16>, vector<32x32xbf16>, vector<8x32xf32> -> vector<8x32xf32>
    %c0_69 = arith.constant 0 : index
    %c0_70 = arith.constant 0 : index
    %177 = vector.load %arg14[%c0_69, %c0_70] : memref<1x32xf32, #tpu.memory_space<vmem>>, vector<1x32xf32>
    %178 = vector.broadcast %177 : vector<1x32xf32> to vector<8x32xf32>
    %179 = arith.addf %176, %178 : vector<8x32xf32>
    %cst_71 = arith.constant 5.000000e-01 : f32
    %180 = vector.broadcast %cst_71 : f32 to vector<8x32xf32>
    %181 = arith.mulf %180, %179 : vector<8x32xf32>
    %cst_72 = arith.constant 4.471500e-02 : f32
    %182 = vector.broadcast %cst_72 : f32 to vector<8x32xf32>
    %183 = arith.mulf %182, %179 : vector<8x32xf32>
    %184 = arith.mulf %183, %179 : vector<8x32xf32>
    %185 = arith.mulf %184, %179 : vector<8x32xf32>
    %186 = arith.addf %179, %185 : vector<8x32xf32>
    %cst_73 = arith.constant 0.797884583 : f32
    %187 = vector.broadcast %cst_73 : f32 to vector<8x32xf32>
    %188 = arith.mulf %187, %186 : vector<8x32xf32>
    %189 = math.tanh %188 : vector<8x32xf32>
    %cst_74 = arith.constant 1.000000e+00 : f32
    %190 = vector.broadcast %cst_74 : f32 to vector<8x32xf32>
    %191 = arith.addf %190, %189 : vector<8x32xf32>
    %192 = arith.mulf %181, %191 : vector<8x32xf32>
    %193 = arith.truncf %192 : vector<8x32xf32> to vector<8x32xbf16>
    %c0_75 = arith.constant 0 : index
    %c0_76 = arith.constant 0 : index
    %194 = vector.load %arg15[%c0_75, %c0_76] : memref<32x32xbf16, #tpu.memory_space<vmem>>, vector<32x32xbf16>
    %cst_77 = arith.constant dense<0.000000e+00> : vector<8x32xf32>
    %195 = tpu.matmul %193, %194, %cst_77 {dimension_numbers = #tpu.dot_dimension_numbers<[1], [0], [0], [1], [0, 0, 1, 1], [], []>} : vector<8x32xbf16>, vector<32x32xbf16>, vector<8x32xf32> -> vector<8x32xf32>
    %c0_78 = arith.constant 0 : index
    %c0_79 = arith.constant 0 : index
    %196 = vector.load %arg16[%c0_78, %c0_79] : memref<1x32xf32, #tpu.memory_space<vmem>>, vector<1x32xf32>
    %197 = vector.broadcast %196 : vector<1x32xf32> to vector<8x32xf32>
    %198 = arith.addf %195, %197 : vector<8x32xf32>
    %c0_80 = arith.constant 0 : index
    %c0_81 = arith.constant 0 : index
    %199 = vector.load %arg17[%c0_80, %c0_81] : memref<1x32xf32, #tpu.memory_space<vmem>>, vector<1x32xf32>
    %c0_82 = arith.constant 0 : index
    %c0_83 = arith.constant 0 : index
    %200 = vector.load %arg18[%c0_82, %c0_83] : memref<1x32xf32, #tpu.memory_space<vmem>>, vector<1x32xf32>
    %cst_84 = arith.constant dense<0.000000e+00> : vector<8xf32>
    %201 = vector.multi_reduction <add>, %198, %cst_84 [1] : vector<8x32xf32> to vector<8xf32>
    %202 = vector.shape_cast %201 : vector<8xf32> to vector<8x1xf32>
    %cst_85 = arith.constant 3.200000e+01 : f32
    %203 = vector.broadcast %cst_85 : f32 to vector<8x1xf32>
    %204 = arith.divf %202, %203 : vector<8x1xf32>
    %205 = vector.broadcast %204 : vector<8x1xf32> to vector<8x32xf32>
    %206 = arith.subf %198, %205 : vector<8x32xf32>
    %207 = arith.mulf %206, %206 : vector<8x32xf32>
    %cst_86 = arith.constant dense<0.000000e+00> : vector<8xf32>
    %208 = vector.multi_reduction <add>, %207, %cst_86 [1] : vector<8x32xf32> to vector<8xf32>
    %209 = vector.shape_cast %208 : vector<8xf32> to vector<8x1xf32>
    %cst_87 = arith.constant 3.200000e+01 : f32
    %210 = vector.broadcast %cst_87 : f32 to vector<8x1xf32>
    %211 = arith.divf %209, %210 : vector<8x1xf32>
    %212 = vector.broadcast %204 : vector<8x1xf32> to vector<8x32xf32>
    %213 = arith.subf %198, %212 : vector<8x32xf32>
    %cst_88 = arith.constant 9.99999974E-6 : f32
    %214 = vector.broadcast %cst_88 : f32 to vector<8x1xf32>
    %215 = arith.addf %211, %214 : vector<8x1xf32>
    %216 = math.rsqrt %215 : vector<8x1xf32>
    %217 = vector.broadcast %216 : vector<8x1xf32> to vector<8x32xf32>
    %218 = arith.mulf %213, %217 : vector<8x32xf32>
    %219 = vector.broadcast %199 : vector<1x32xf32> to vector<8x32xf32>
    %220 = arith.mulf %218, %219 : vector<8x32xf32>
    %221 = vector.broadcast %200 : vector<1x32xf32> to vector<8x32xf32>
    %222 = arith.addf %220, %221 : vector<8x32xf32>
    %223 = arith.truncf %222 : vector<8x32xf32> to vector<8x32xbf16>
    %c0_89 = arith.constant 0 : index
    %c0_90 = arith.constant 0 : index
    %224 = vector.load %arg19[%c0_89, %c0_90] : memref<32x128xbf16, #tpu.memory_space<vmem>>, vector<32x128xbf16>
    %cst_91 = arith.constant dense<0.000000e+00> : vector<8x128xf32>
    %225 = tpu.matmul %223, %224, %cst_91 {dimension_numbers = #tpu.dot_dimension_numbers<[1], [0], [0], [1], [0, 0, 1, 1], [], []>} : vector<8x32xbf16>, vector<32x128xbf16>, vector<8x128xf32> -> vector<8x128xf32>
    %c0_92 = arith.constant 0 : index
    %c0_93 = arith.constant 0 : index
    %226 = vector.load %arg20[%c0_92, %c0_93] : memref<1x128xf32, #tpu.memory_space<vmem>>, vector<1x128xf32>
    %227 = vector.broadcast %226 : vector<1x128xf32> to vector<8x128xf32>
    %228 = arith.addf %225, %227 : vector<8x128xf32>
    %cst_94 = arith.constant dense<0xFF800000> : vector<8xf32>
    %229 = vector.multi_reduction <maximumf>, %228, %cst_94 [1] : vector<8x128xf32> to vector<8xf32>
    %230 = vector.shape_cast %229 : vector<8xf32> to vector<8x1xf32>
    %231 = vector.broadcast %230 : vector<8x1xf32> to vector<8x128xf32>
    %232 = arith.subf %228, %231 : vector<8x128xf32>
    %233 = math.exp %232 : vector<8x128xf32>
    %cst_95 = arith.constant dense<0.000000e+00> : vector<8xf32>
    %234 = vector.multi_reduction <add>, %233, %cst_95 [1] : vector<8x128xf32> to vector<8xf32>
    %235 = vector.shape_cast %234 : vector<8xf32> to vector<8x1xf32>
    %236 = math.log %235 : vector<8x1xf32>
    %237 = arith.addf %230, %236 : vector<8x1xf32>
    %238 = vector.broadcast %237 : vector<8x1xf32> to vector<8x128xf32>
    %239 = arith.subf %228, %238 : vector<8x128xf32>
    %c0_96 = arith.constant 0 : index
    %c0_97 = arith.constant 0 : index
    %c0_98 = arith.constant 0 : index
    %240 = vector.load %arg23[%c0_96, %c0_97, %c0_98] : memref<1x8x128xf32, #tpu.memory_space<vmem>>, vector<1x8x128xf32>
    %241 = vector.shape_cast %240 : vector<1x8x128xf32> to vector<8x128xf32>
    %242 = vector.shape_cast %239 : vector<8x128xf32> to vector<1x8x128xf32>
    tpu.vector_store %arg23[%c0_96, %c0_97, %c0_98], %242 {strides = array<i32>} : memref<1x8x128xf32, #tpu.memory_space<vmem>>, vector<1x8x128xf32>,
    %243 = vector.extract_strided_slice %223 {offsets = [0, 0], sizes = [1, 32], strides = [1, 1]} : vector<8x32xbf16> to vector<1x32xbf16>
    %c0_99 = arith.constant 0 : index
    %c0_100 = arith.constant 0 : index
    %244 = vector.load %arg21[%c0_99, %c0_100] : memref<32x128xbf16, #tpu.memory_space<vmem>>, vector<32x128xbf16>
    %cst_101 = arith.constant dense<0.000000e+00> : vector<1x128xf32>
    %245 = tpu.matmul %243, %244, %cst_101 {dimension_numbers = #tpu.dot_dimension_numbers<[1], [0], [0], [1], [0, 0, 1, 1], [], []>} : vector<1x32xbf16>, vector<32x128xbf16>, vector<1x128xf32> -> vector<1x128xf32>
    %c0_102 = arith.constant 0 : index
    %c0_103 = arith.constant 0 : index
    %246 = vector.load %arg22[%c0_102, %c0_103] : memref<1x128xf32, #tpu.memory_space<vmem>>, vector<1x128xf32>
    %247 = arith.addf %245, %246 : vector<1x128xf32>
    %c0_104 = arith.constant 0 : index
    %c0_105 = arith.constant 0 : index
    %c0_106 = arith.constant 0 : index
    %248 = vector.load %arg24[%c0_104, %c0_105, %c0_106] : memref<1x1x128xf32, #tpu.memory_space<vmem>>, vector<1x1x128xf32>
    %249 = vector.shape_cast %248 : vector<1x1x128xf32> to vector<1x128xf32>
    %250 = vector.shape_cast %247 : vector<1x128xf32> to vector<1x1x128xf32>
    tpu.vector_store %arg24[%c0_104, %c0_105, %c0_106], %250 {strides = array<i32>} : memref<1x1x128xf32, #tpu.memory_space<vmem>>, vector<1x1x128xf32>,
    return
  }
  func.func @transform_0(%arg0: i32) -> (i32, i32, i32) {
    %c0_i32 = arith.constant 0 : i32
    %c0_i32_0 = arith.constant 0 : i32
    %c0_i32_1 = arith.constant 0 : i32
    return %arg0, %c0_i32, %c0_i32_0 : i32, i32, i32
  }
  func.func @transform_1(%arg0: i32) -> (i32, i32, i32) {
    %c0_i32 = arith.constant 0 : i32
    %c0_i32_0 = arith.constant 0 : i32
    %c0_i32_1 = arith.constant 0 : i32
    return %arg0, %c0_i32, %c0_i32_0 : i32, i32, i32
  }
  func.func @transform_2(%arg0: i32) -> (i32, i32) {
    %c0_i32 = arith.constant 0 : i32
    %c0_i32_0 = arith.constant 0 : i32
    %c0_i32_1 = arith.constant 0 : i32
    return %c0_i32, %c0_i32_0 : i32, i32
  }
  func.func @transform_3(%arg0: i32) -> (i32, i32, i32) {
    %c0_i32 = arith.constant 0 : i32
    %c0_i32_0 = arith.constant 0 : i32
    %c0_i32_1 = arith.constant 0 : i32
    return %arg0, %c0_i32, %c0_i32_0 : i32, i32, i32
  }
  func.func @transform_4(%arg0: i32) -> (i32, i32) {
    %c0_i32 = arith.constant 0 : i32
    %c0_i32_0 = arith.constant 0 : i32
    %c0_i32_1 = arith.constant 0 : i32
    return %c0_i32, %c0_i32_0 : i32, i32
  }
  func.func @transform_5(%arg0: i32) -> (i32, i32) {
    %c0_i32 = arith.constant 0 : i32
    %c0_i32_0 = arith.constant 0 : i32
    %c0_i32_1 = arith.constant 0 : i32
    return %c0_i32, %c0_i32_0 : i32, i32
  }
  func.func @transform_6(%arg0: i32) -> (i32, i32) {
    %c0_i32 = arith.constant 0 : i32
    %c0_i32_0 = arith.constant 0 : i32
    %c0_i32_1 = arith.constant 0 : i32
    return %c0_i32, %c0_i32_0 : i32, i32
  }
  func.func @transform_7(%arg0: i32) -> (i32, i32) {
    %c0_i32 = arith.constant 0 : i32
    %c0_i32_0 = arith.constant 0 : i32
    %c0_i32_1 = arith.constant 0 : i32
    return %c0_i32, %c0_i32_0 : i32, i32
  }
  func.func @transform_8(%arg0: i32) -> (i32, i32) {
    %c0_i32 = arith.constant 0 : i32
    %c0_i32_0 = arith.constant 0 : i32
    %c0_i32_1 = arith.constant 0 : i32
    return %c0_i32, %c0_i32_0 : i32, i32
  }
  func.func @transform_9(%arg0: i32) -> (i32, i32) {
    %c0_i32 = arith.constant 0 : i32
    %c0_i32_0 = arith.constant 0 : i32
    %c0_i32_1 = arith.constant 0 : i32
    return %c0_i32, %c0_i32_0 : i32, i32
  }
  func.func @transform_10(%arg0: i32) -> (i32, i32) {
    %c0_i32 = arith.constant 0 : i32
    %c0_i32_0 = arith.constant 0 : i32
    %c0_i32_1 = arith.constant 0 : i32
    return %c0_i32, %c0_i32_0 : i32, i32
  }
  func.func @transform_11(%arg0: i32) -> (i32, i32) {
    %c0_i32 = arith.constant 0 : i32
    %c0_i32_0 = arith.constant 0 : i32
    %c0_i32_1 = arith.constant 0 : i32
    return %c0_i32, %c0_i32_0 : i32, i32
  }
  func.func @transform_12(%arg0: i32) -> (i32, i32) {
    %c0_i32 = arith.constant 0 : i32
    %c0_i32_0 = arith.constant 0 : i32
    %c0_i32_1 = arith.constant 0 : i32
    return %c0_i32, %c0_i32_0 : i32, i32
  }
  func.func @transform_13(%arg0: i32) -> (i32, i32) {
    %c0_i32 = arith.constant 0 : i32
    %c0_i32_0 = arith.constant 0 : i32
    %c0_i32_1 = arith.constant 0 : i32
    return %c0_i32, %c0_i32_0 : i32, i32
  }
  func.func @transform_14(%arg0: i32) -> (i32, i32) {
    %c0_i32 = arith.constant 0 : i32
    %c0_i32_0 = arith.constant 0 : i32
    %c0_i32_1 = arith.constant 0 : i32
    return %c0_i32, %c0_i32_0 : i32, i32
  }
  func.func @transform_15(%arg0: i32) -> (i32, i32) {
    %c0_i32 = arith.constant 0 : i32
    %c0_i32_0 = arith.constant 0 : i32
    %c0_i32_1 = arith.constant 0 : i32
    return %c0_i32, %c0_i32_0 : i32, i32
  }
  func.func @transform_16(%arg0: i32) -> (i32, i32) {
    %c0_i32 = arith.constant 0 : i32
    %c0_i32_0 = arith.constant 0 : i32
    %c0_i32_1 = arith.constant 0 : i32
    return %c0_i32, %c0_i32_0 : i32, i32
  }
  func.func @transform_17(%arg0: i32) -> (i32, i32) {
    %c0_i32 = arith.constant 0 : i32
    %c0_i32_0 = arith.constant 0 : i32
    %c0_i32_1 = arith.constant 0 : i32
    return %c0_i32, %c0_i32_0 : i32, i32
  }
  func.func @transform_18(%arg0: i32) -> (i32, i32) {
    %c0_i32 = arith.constant 0 : i32
    %c0_i32_0 = arith.constant 0 : i32
    %c0_i32_1 = arith.constant 0 : i32
    return %c0_i32, %c0_i32_0 : i32, i32
  }
  func.func @transform_19(%arg0: i32) -> (i32, i32) {
    %c0_i32 = arith.constant 0 : i32
    %c0_i32_0 = arith.constant 0 : i32
    %c0_i32_1 = arith.constant 0 : i32
    return %c0_i32, %c0_i32_0 : i32, i32
  }
  func.func @transform_20(%arg0: i32) -> (i32, i32) {
    %c0_i32 = arith.constant 0 : i32
    %c0_i32_0 = arith.constant 0 : i32
    %c0_i32_1 = arith.constant 0 : i32
    return %c0_i32, %c0_i32_0 : i32, i32
  }
  func.func @transform_21(%arg0: i32) -> (i32, i32) {
    %c0_i32 = arith.constant 0 : i32
    %c0_i32_0 = arith.constant 0 : i32
    %c0_i32_1 = arith.constant 0 : i32
    return %c0_i32, %c0_i32_0 : i32, i32
  }
  func.func @transform_22(%arg0: i32) -> (i32, i32, i32) {
    %c0_i32 = arith.constant 0 : i32
    %c0_i32_0 = arith.constant 0 : i32
    %c0_i32_1 = arith.constant 0 : i32
    return %arg0, %c0_i32, %c0_i32_0 : i32, i32, i32
  }
  func.func @transform_23(%arg0: i32) -> (i32, i32, i32) {
    %c0_i32 = arith.constant 0 : i32
    %c0_i32_0 = arith.constant 0 : i32
    %c0_i32_1 = arith.constant 0 : i32
    return %arg0, %c0_i32, %c0_i32_0 : i32, i32, i32
  }
}

</mosaic_0001>

<bundles_post_ra>
// kernel: tpu_custom_call.1
= control target key start
LH: loop header
LB: loop body
LE: loop exit
PB: predicated region body
PF: predicated region fallthrough
CT: control target
= control target key end

     0   :  { %s3901_s0 = inlined_call_operand.hbm [shape: bf16[2,8,32], index: 0, kind: input, shape index: {}]   ;;  %s3902_s1 = inlined_call_operand.hbm [shape: bf16[2,8,32], index: 1, kind: input, shape index: {}]   ;;  %s3903_s2 = inlined_call_operand.hbm [shape: f32[8,32], index: 2, kind: input, shape index: {}]   ;;  %s3904_s3 = inlined_call_operand.vmem [shape: f32[2,8,8], index: 3, kind: input, shape index: {}]   ;;  %s3905_s4 = inlined_call_operand.vmem [shape: f32[1,32], index: 4, kind: input, shape index: {}]   ;;  %s3906_s5 = inlined_call_operand.hbm [shape: f32[1,32], index: 5, kind: input, shape index: {}]   ;;  %s3907_s6 = inlined_call_operand.vmem [shape: bf16[32,384], index: 6, kind: input, shape index: {}]   ;;  %s3908_s7 = inlined_call_operand.hbm [shape: f32[1,384], index: 7, kind: input, shape index: {}]   ;;  %s3909_s8 = inlined_call_operand.vmem [shape: bf16[128,32], index: 8, kind: input, shape index: {}]   ;;  %s3910_s9 = inlined_call_operand.hbm [shape: f32[1,32], index: 9, kind: input, shape index: {}]   ;;  %s3911_s10 = inlined_call_operand.hbm [shape: f32[1,32], index: 10, kind: input, shape index: {}]   ;;  %s3912_s11 = inlined_call_operand.hbm [shape: f32[1,32], index: 11, kind: input, shape index: {}]   ;;  %s3913_s12 = inlined_call_operand.vmem [shape: bf16[32,32], index: 12, kind: input, shape index: {}]   ;;  %s3914_s13 = inlined_call_operand.hbm [shape: f32[1,32], index: 13, kind: input, shape index: {}]   ;;  %s3915_s14 = inlined_call_operand.vmem [shape: bf16[32,32], index: 14, kind: input, shape index: {}]   ;;  %s3916_s15 = inlined_call_operand.vmem [shape: f32[1,32], index: 15, kind: input, shape index: {}]   ;;  %s3917_s16 = inlined_call_operand.vmem [shape: f32[1,32], index: 16, kind: input, shape index: {}]   ;;  %s3918_s17 = inlined_call_operand.vmem [shape: f32[1,32], index: 17, kind: input, shape index: {}]   ;;  %s3919_s18 = inlined_call_operand.vmem [shape: bf16[32,128], index: 18, kind: input, shape index: {}]   ;;  %s3920_s19 = inlined_call_operand.vmem [shape: f32[1,128], index: 19, kind: input, shape index: {}]   ;;  %s3921_s20 = inlined_call_operand.vmem [shape: bf16[32,128], index: 20, kind: input, shape index: {}]   ;;  %s3922_s21 = inlined_call_operand.vmem [shape: f32[1,128], index: 21, kind: input, shape index: {}]   ;;  %s3923_s22 = inlined_call_operand.hbm [shape: f32[2,8,128], index: 22, kind: output, shape index: {0}]   ;;  %s3924_s23 = inlined_call_operand.hbm [shape: f32[2,1,128], index: 23, kind: output, shape index: {1}]  }
   0x1   :  { %3943 = sst [smem:[#allocation30_spill]] %s3901_s0 }
   0x2   :  { %3944 = sst [smem:[#allocation31_spill]] %s3902_s1 }
   0x3   :  { %3945 = sst [smem:[#allocation32_spill]] %s3903_s2 }
   0x4   :  { %3946 = sst [smem:[#allocation33_spill]] %s3904_s3 }
   0x5   :  { %3947 = sst [smem:[#allocation34_spill]] %s3905_s4 }
   0x6   :  { %3948 = sst [smem:[#allocation35_spill]] %s3906_s5 }
   0x7   :  { %3949 = sst [smem:[#allocation36_spill]] %s3907_s6 }
   0x8   :  { %3950 = sst [smem:[#allocation37_spill]] %s3908_s7 }
   0x9   :  { %3951 = sst [smem:[#allocation38_spill]] %s3910_s9 }
   0xa   :  { %3952 = sst [smem:[#allocation39_spill]] %s3911_s10 }
   0xb   :  { %3953 = sst [smem:[#allocation40_spill]] %s3912_s11 }
   0xc   :  { %3954 = sst [smem:[#allocation41_spill]] %s3914_s13 }
   0xd   :  { %3955 = sst [smem:[#allocation42_spill]] %s3917_s16 }
   0xe   :  { %3956 = sst [smem:[#allocation43_spill]] %s3918_s17 }
   0xf   :  { %3957 = sst [smem:[#allocation44_spill]] %s3919_s18 }
  0x10   :  { %3958 = sst [smem:[#allocation45_spill]] %s3920_s19 }
  0x11   :  { %3959 = sst [smem:[#allocation46_spill]] %s3921_s20 }
  0x12   :  { %3960 = sst [smem:[#allocation47_spill]] %s3922_s21 }
  0x13   :  { %3961 = sst [smem:[#allocation48_spill]] %s3923_s22 }
  0x14   :  { %3962 = sst [smem:[#allocation49_spill]] %s3924_s23 }
  0x15   :  { %29 = vsyncpa [#allocation3], 0 }
  0x16   :  { %31 = vsyncpa [#allocation3 + $0x1], 0 }
  0x17   :  { %32 = vsyncpa [#allocation6], 0 }
  0x18   :  { %34 = vsyncpa [#allocation6 + $0x1], 0 }
  0x19   :  { %35 = vsyncpa [#allocation9], 0 }
  0x1a   :  { %36 = vsyncpa [#allocation12], 0 }
  0x1b   :  { %37 = vsyncpa [#allocation15], 0 }
  0x1c   :  { %38 = vsyncpa [#allocation4], 0 }
  0x1d   :  { %40 = vsyncpa [#allocation4 + $0x1], 0 }
  0x1e   :  { %41 = vsyncpa [#allocation19], 0 }
  0x1f   :  { %43 = vsyncpa [#allocation19 + $0x1], 0  ;;  %s3270_s4 = smov 0   ;;  %s3272_s30 = smov 0  }
  0x20   :  { %s3274_s24 = smov 0   ;;  %s3276_s25 = smov 0  }
  0x21 LB: > { %3963 = sst [smem:[#allocation28_spill]] %s3127_s24  ;;  %s3133_s5 = smov [#allocation7]   ;;  %s3131_s25 = sphi %s3276_s25, %s4010_s25   ;;  %s3127_s24 = sphi %s3274_s24, %s4007_s24   ;;  %s3123_s30 = sphi %s3272_s30, %s4009_s30   ;;  %s3119_s4 = sphi %s3270_s4, %s4008_s4  }
  0x22   : > { %s596_s1 = sshll.u32 %s3133_s5, 4  ;;  %s3291_s26 = sadd.s32 4294967295, %s3131_s25   ;;  %s3296_s1 = int_to_ptr.vmem [resolvable:$true] %s596_s1 }
  0x23   : > { %p2329_p0 = scmp.ge.s32.totalorder %s3131_s25, 1  ;;  %p3935_p1 = scmp.eq.s32.totalorder %s3291_s26, 0 }
  0x24   : > { %p583_p2 = scmp.lt.s32.totalorder %s3131_s25, 3  ;;  %s3134_s6 = smov [#allocation8]  }
  0x25   : > { %s610_s27 = sshll.u32 %s3134_s6, 4  ;;  %s3135_s7 = smov [#allocation11]   ;;  %s3305_s27 = int_to_ptr.vmem [resolvable:$true] %s610_s27 }
  0x26   : > { %p3298_p3 = pnand %p2329_p0, %p583_p2  ;;  %s638_s28 = sshll.u32 %s3135_s7, 4  ;;  %s3313_s28 = int_to_ptr.vmem [resolvable:$true] %s638_s28 }
  0x27   : > { %s3136_s3 = smov [#allocation14]   ;;  %s3966_s23 = sld [smem:[#allocation32_spill]] }
  0x28   : > { %s3964_s2 = scalar_select %p3298_p3, 1, 0 }
  0x29   : > { %p2608_p5 = pneg %p3298_p3  ;;  %s3315_s0 = sshll.u32 %s3136_s3, 4  ;;  %s661_s0 = int_to_ptr.vmem [resolvable:$true] %s3315_s0 }
  0x2b   : > { %p3309_p6 = pnand %p2608_p5, %p3935_p1 }
  0x2d   : > { %s2757_s21 = scalar_lea.hbm %s3966_s23, 128  ;;  %p3325_p8 = pneg %p3309_p6 }
  0x2e   : > { %p2758_p7 = scmp.ne.s32.totalorder %s3966_s23, %s2757_s21  ;;  %p2764_p11 = scmp.lt.u32.totalorder %s2757_s21, %s3966_s23 }
  0x30   : > { %p2760_p9 = pnand %p3325_p8, %p2758_p7 }
  0x32   : > { %p2761_p10 = pneg %p2760_p9 }
  0x34   : > { %p2766_p12 = pnand %p2764_p11, %p2761_p10 }
  0x36   : > { %2769 = shalt.err (!%p2766_p12)
}
  0x37   : > { %s2770_s19 = scalar_lea.vmem %s3296_s1, 128  ;;  %p2778_p5 = scmp.lt.s32.totalorder %s3296_s1, %s3296_s1 }
  0x38   : > { %p2771_p13 = scmp.ne.s32.totalorder %s3296_s1, %s2770_s19  ;;  %p2779_p4 = scmp.lt.s32.totalorder %s2770_s19, %s2770_s19 }
  0x3a   : > { %p2773_p0 = pnand %p2771_p13, %p3325_p8  ;;  %p2780_p7 = por %p2779_p4, %p2778_p5 }
  0x3c   : > { %p2774_p2 = pneg %p2773_p0 }
  0x3e   : > { %p2781_p9 = pnand %p2780_p7, %p2774_p2 }
  0x40   : > { %2784 = shalt.err (!%p2781_p9)
}
  0x41   : > { %2611 = dma.hbm_to_vmem [thread:$0]  (!%p3309_p6), %s3966_s23, 128, %s3296_s1, [#allocation6]  }
  0x42   : > { %s3968_s6 = sld [smem:[#allocation35_spill]] }
  0x48   : > { %s2785_s3 = scalar_lea.hbm %s3968_s6, 16 }
  0x49   : > { %p2786_p10 = scmp.ne.s32.totalorder %s3968_s6, %s2785_s3  ;;  %p2792_p12 = scmp.lt.u32.totalorder %s2785_s3, %s3968_s6 }
  0x4b   : > { %p2788_p4 = pnand %p2786_p10, %p3325_p8 }
  0x4d   : > { %p2789_p11 = pneg %p2788_p4 }
  0x4f   : > { %p2794_p13 = pnand %p2792_p12, %p2789_p11 }
  0x51   : > { %2797 = shalt.err (!%p2794_p13)
}
  0x52   : > { %s2798_s1 = scalar_lea.vmem %s3305_s27, 16  ;;  %s2805_s16 = scalar_lea.vmem %s3305_s27, 32 }
  0x53   : > { %p2799_p0 = scmp.ne.s32.totalorder %s3305_s27, %s2798_s1  ;;  %p2806_p7 = scmp.lt.s32.totalorder %s3305_s27, %s3305_s27 }
  0x54   : > { %p2807_p9 = scmp.lt.s32.totalorder %s2805_s16, %s2798_s1 }
  0x55   : > { %p2801_p2 = pnand %p2799_p0, %p3325_p8 }
  0x56   : > { %p2808_p10 = por %p2807_p9, %p2806_p7 }
  0x57   : > { %p2802_p5 = pneg %p2801_p2 }
  0x59   : > { %p2809_p4 = pnand %p2808_p10, %p2802_p5 }
  0x5b   : > { %2812 = shalt.err (!%p2809_p4)
}
  0x5c   : > { %2614 = dma.hbm_to_vmem [thread:$0]  (!%p3309_p6), %s3968_s6, 16, %s3305_s27, [#allocation9]  }
  0x5d   : > { %s3969_s9 = sld [smem:[#allocation38_spill]] }
  0x63   : > { %s2813_s22 = scalar_lea.hbm %s3969_s9, 16 }
  0x64   : > { %p2814_p11 = scmp.ne.s32.totalorder %s3969_s9, %s2813_s22  ;;  %p2820_p0 = scmp.lt.u32.totalorder %s2813_s22, %s3969_s9 }
  0x66   : > { %p2816_p12 = pnand %p2814_p11, %p3325_p8 }
  0x68   : > { %p2817_p13 = pneg %p2816_p12 }
  0x6a   : > { %p2822_p2 = pnand %p2820_p0, %p2817_p13 }
  0x6c   : > { %2825 = shalt.err (!%p2822_p2)
}
  0x6d   : > { %s2826_s27 = scalar_lea.vmem %s3313_s28, 16  ;;  %s2833_s16 = scalar_lea.vmem %s3313_s28, 32 }
  0x6e   : > { %p2827_p5 = scmp.ne.s32.totalorder %s3313_s28, %s2826_s27  ;;  %p2834_p10 = scmp.lt.s32.totalorder %s3313_s28, %s3313_s28 }
  0x6f   : > { %p2835_p4 = scmp.lt.s32.totalorder %s2833_s16, %s2826_s27 }
  0x70   : > { %p2829_p7 = pnand %p2827_p5, %p3325_p8 }
  0x71   : > { %p2836_p11 = por %p2835_p4, %p2834_p10 }
  0x72   : > { %p2830_p9 = pneg %p2829_p7 }
  0x74   : > { %p2837_p12 = pnand %p2836_p11, %p2830_p9 }
  0x76   : > { %2840 = shalt.err (!%p2837_p12)
}
  0x77   : > { %2620 = dma.hbm_to_vmem [thread:$0]  (!%p3309_p6), %s3969_s9, 16, %s3313_s28, [#allocation12]  }
  0x78   : > { %s3137_s17 = smov [#allocation10]   ;;  %s3970_s11 = sld [smem:[#allocation40_spill]] }
  0x79   : > { %s624_s21 = sshll.u32 %s3137_s17, 4  ;;  %s625_s21 = int_to_ptr.vmem [resolvable:$true] %s624_s21 }
  0x7e   : > { %s2841_s3 = scalar_lea.hbm %s3970_s11, 16 }
  0x7f   : > { %p2842_p13 = scmp.ne.s32.totalorder %s3970_s11, %s2841_s3  ;;  %p2848_p5 = scmp.lt.u32.totalorder %s2841_s3, %s3970_s11 }
  0x81   : > { %p2844_p0 = pnand %p2842_p13, %p3325_p8 }
  0x83   : > { %p2845_p2 = pneg %p2844_p0 }
  0x85   : > { %p2850_p7 = pnand %p2848_p5, %p2845_p2 }
  0x87   : > { %2853 = shalt.err (!%p2850_p7)
}
  0x88   : > { %s2854_s28 = scalar_lea.vmem %s661_s0, 16  ;;  %s2861_s18 = scalar_lea.vmem %s661_s0, 32 }
  0x89   : > { %p2855_p9 = scmp.ne.s32.totalorder %s661_s0, %s2854_s28  ;;  %p2862_p11 = scmp.lt.s32.totalorder %s661_s0, %s661_s0 }
  0x8a   : > { %p2863_p12 = scmp.lt.s32.totalorder %s2861_s18, %s2854_s28 }
  0x8b   : > { %p2857_p10 = pnand %p2855_p9, %p3325_p8 }
  0x8c   : > { %p2864_p1 = por %p2863_p12, %p2862_p11 }
  0x8d   : > { %p2858_p4 = pneg %p2857_p10 }
  0x8f   : > { %p2865_p3 = pnand %p2864_p1, %p2858_p4 }
  0x91   : > { %2868 = shalt.err (!%p2865_p3)
}
  0x92   : > { %2626 = dma.hbm_to_vmem [thread:$0]  (!%p3309_p6), %s3970_s11, 16, %s661_s0, [#allocation15]  }
  0x93   : > { %s3971_s3 = sld [smem:[#allocation37_spill]] }
  0x99   : > { %s2869_s19 = scalar_lea.hbm %s3971_s3, 48 }
  0x9a   : > { %p2870_p13 = scmp.ne.s32.totalorder %s3971_s3, %s2869_s19  ;;  %p2876_p3 = scmp.lt.u32.totalorder %s2869_s19, %s3971_s3 }
  0x9c   : > { %p2872_p0 = pnand %p2870_p13, %p3325_p8 }
  0x9e   : > { %p2873_p1 = pneg %p2872_p0 }
  0xa0   : > { %p2878_p2 = pnand %p2876_p3, %p2873_p1 }
  0xa2   : > { %2881 = shalt.err (!%p2878_p2)
}
  0xa3   : > { %s2882_s18 = scalar_lea.vmem %s625_s21, 48  ;;  %s2889_s0 = scalar_lea.vmem %s625_s21, 64 }
  0xa4   : > { %p2883_p5 = scmp.ne.s32.totalorder %s625_s21, %s2882_s18  ;;  %p2890_p10 = scmp.lt.s32.totalorder %s625_s21, %s625_s21 }
  0xa5   : > { %p2891_p4 = scmp.lt.s32.totalorder %s2889_s0, %s2882_s18 }
  0xa6   : > { %p2885_p7 = pnand %p2883_p5, %p3325_p8 }
  0xa7   : > { %p2892_p11 = por %p2891_p4, %p2890_p10 }
  0xa8   : > { %p2886_p9 = pneg %p2885_p7 }
  0xaa   : > { %p2893_p12 = pnand %p2892_p11, %p2886_p9 }
  0xac   : > { %2896 = shalt.err (!%p2893_p12)
}
  0xad   : > { %2617 = dma.hbm_to_vmem [thread:$0]  (!%p3309_p6), %s3971_s3, 48, %s625_s21, [#allocation9]  }
  0xae   : > { %s3138_s22 = smov [#allocation13]   ;;  %s3139_s19 = smov [#allocation16]  }
  0xaf   : > { %s649_s5 = sshll.u32 %s3138_s22, 4  ;;  %s674_s1 = sshll.u32 %s3139_s19, 4  ;;  %s650_s5 = int_to_ptr.vmem [resolvable:$true] %s649_s5  ;;  %s675_s1 = int_to_ptr.vmem [resolvable:$true] %s674_s1 }
  0xb0   : > { %s3972_s10 = sld [smem:[#allocation39_spill]] }
  0xb6   : > { %s2897_s28 = scalar_lea.hbm %s3972_s10, 16 }
  0xb7   : > { %p2898_p13 = scmp.ne.s32.totalorder %s3972_s10, %s2897_s28  ;;  %p2904_p3 = scmp.lt.u32.totalorder %s2897_s28, %s3972_s10 }
  0xb9   : > { %p2900_p0 = pnand %p2898_p13, %p3325_p8 }
  0xbb   : > { %p2901_p1 = pneg %p2900_p0 }
  0xbd   : > { %p2906_p2 = pnand %p2904_p3, %p2901_p1 }
  0xbf   : > { %2909 = shalt.err (!%p2906_p2)
}
  0xc0   : > { %s2910_s21 = scalar_lea.vmem %s650_s5, 16  ;;  %s2917_s17 = scalar_lea.vmem %s650_s5, 32 }
  0xc1   : > { %p2911_p5 = scmp.ne.s32.totalorder %s650_s5, %s2910_s21  ;;  %p2918_p10 = scmp.lt.s32.totalorder %s650_s5, %s650_s5 }
  0xc2   : > { %p2919_p4 = scmp.lt.s32.totalorder %s2917_s17, %s2910_s21 }
  0xc3   : > { %p2913_p7 = pnand %p2911_p5, %p3325_p8 }
  0xc4   : > { %p2920_p11 = por %p2919_p4, %p2918_p10 }
  0xc5   : > { %p2914_p9 = pneg %p2913_p7 }
  0xc7   : > { %p2921_p12 = pnand %p2920_p11, %p2914_p9 }
  0xc9   : > { %2924 = shalt.err (!%p2921_p12)
}
  0xca   : > { %2623 = dma.hbm_to_vmem [thread:$0]  (!%p3309_p6), %s3972_s10, 16, %s650_s5, [#allocation12]  }
  0xcb   : > { %s3973_s13 = sld [smem:[#allocation41_spill]] }
  0xd1   : > { %s2925_s16 = scalar_lea.hbm %s3973_s13, 16 }
  0xd2   : > { %p2926_p13 = scmp.ne.s32.totalorder %s3973_s13, %s2925_s16  ;;  %p2932_p3 = scmp.lt.u32.totalorder %s2925_s16, %s3973_s13 }
  0xd4   : > { %p2928_p0 = pnand %p2926_p13, %p3325_p8 }
  0xd6   : > { %p2929_p1 = pneg %p2928_p0 }
  0xd8   : > { %p2934_p2 = pnand %p2932_p3, %p2929_p1 }
  0xda   : > { %2937 = shalt.err (!%p2934_p2)
}
  0xdb   : > { %s2938_s21 = scalar_lea.vmem %s675_s1, 16  ;;  %s2945_s5 = scalar_lea.vmem %s675_s1, 32 }
  0xdc   : > { %p2939_p5 = scmp.ne.s32.totalorder %s675_s1, %s2938_s21  ;;  %p2946_p10 = scmp.lt.s32.totalorder %s675_s1, %s675_s1 }
  0xdd   : > { %p2947_p4 = scmp.lt.s32.totalorder %s2945_s5, %s2938_s21 }
  0xde   : > { %p2941_p7 = pnand %p2939_p5, %p3325_p8 }
  0xdf   : > { %p2948_p11 = por %p2947_p4, %p2946_p10 }
  0xe0   : > { %p2942_p9 = pneg %p2941_p7 }
  0xe2   : > { %p2949_p12 = pnand %p2948_p11, %p2942_p9 }
  0xe4   : > { %2952 = shalt.err (!%p2949_p12)
}
  0xe5   : > { %2629 = dma.hbm_to_vmem [thread:$0]  (!%p3309_p6), %s3973_s13, 16, %s675_s1, [#allocation15]  }
  0xe6   : > { %s2328_s7 = sadd.s32 4294967294, %s3131_s25   ;;  %s3469_s29 = sadd.s32 1, %s3131_s25  }
  0xe7   : > { %s56_s19 = sadd.s32 1, %s3127_s24  ;;  %s53_s6 = ssub.s32 %s3131_s25, %s3469_s29 }
  0xe8   : > { %p63_p8 = scmp.ne.s32.totalorder %s3127_s24, %s3123_s30  ;;  %p54_p13 = scmp.eq.s32.totalorder %s53_s6, 0 }
  0xe9   : > { %p64_p0 = scmp.eq.s32.totalorder %s3131_s25, 0  ;;  %p69_p1 = scmp.ne.s32.totalorder %s3123_s30, %s3119_s4 }
  0xea   : > { %p544_p3 = scmp.eq.s32.totalorder %s3291_s26, 1  ;;  %p3975_p5 = scmp.eq.s32.totalorder %s3291_s26, 0 }
  0xeb   : > { %s3481_s27 = scalar_select %p54_p13, %s3127_s24, %s56_s19  }
  0xec   : > { %p65_p2 = por %p64_p0, %p63_p8  ;;  %p3485_p7 = por %p3975_p5, %p69_p1 }
  0xed   : > { %3974 = sst [smem:[#allocation29_spill]] %s3481_s27  ;;  %p3489_p6 = por %p544_p3, %p63_p8 }
  0xee   : > { %s3976_s16 = scalar_select %p3485_p7, 1, 0 }
  0xef   : > { %s3977_s1 = scalar_select %p3489_p6, 1, 0 }
  0xf0   : > { %p550_p9 = scmp.eq.s32.totalorder %s2328_s7, 1  ;;  %p2651_p10 = scmp.lt.s32.totalorder %s3131_s25, 2 }
  0xf1   : > { %s709_s28 = sand.u32 1, %s3127_s24   ;;  %s2339_s20 = sshll.u32 %s3131_s25, 6 }
  0xf2   : > { %p3495_p4 = por %p550_p9, %p69_p1  ;;  %s3499_s0 = sshll.u32 %s709_s28, 2 }
  0xf3   : > { %s3979_s17 = sld [smem:[#allocation30_spill]]  ;;  %s713_s7 = scalar_lea.vmem [#allocation2], %s3499_s0 }
  0xf4   : > { %s3978_s18 = scalar_select %p3495_p4, 1, 0 }
  0xf5   : > { %s720_s19 = sshll.u32 %s713_s7, 4  ;;  %p3508_p11 = pnand %p2651_p10, %p65_p2  ;;  %s3512_s19 = int_to_ptr.vmem [resolvable:$true] %s720_s19 }
  0xf6   : > { %s3981_s10 = sld [smem:[#allocation31_spill]]  ;;  %s710_s5 = scalar_lea.sflag [#allocation3], %s709_s28 }
  0xf7   : > { %p2955_p8 = pneg %p3508_p11 }
  0xf9   : > { %s3505_s22 = scalar_lea.hbm %s3979_s17, %s2339_s20  ;;  %s2958_s23 = scalar_lea.hbm %s3979_s17, 128 }
  0xfa   : > { %s2953_s11 = scalar_lea.hbm %s3505_s22, 64  ;;  %p2959_p1 = scmp.lt.u32.totalorder %s3505_s22, %s3979_s17 }
  0xfb   : > { %p2954_p12 = scmp.ne.s32.totalorder %s3505_s22, %s2953_s11  ;;  %p2960_p3 = scmp.lt.u32.totalorder %s2958_s23, %s2953_s11 }
  0xfc   : > { %s3517_s21 = scalar_lea.hbm %s3981_s10, %s2339_s20  ;;  %p2962_p5 = scmp.lt.u32.totalorder %s2953_s11, %s3505_s22 }
  0xfd   : > { %p2956_p13 = pnand %p2955_p8, %p2954_p12  ;;  %p2961_p2 = por %p2960_p3, %p2959_p1 }
  0xff   : > { %p2957_p0 = pneg %p2956_p13  ;;  %p2963_p9 = por %p2962_p5, %p2961_p2 }
 0x101   : > { %p2964_p10 = pnand %p2963_p9, %p2957_p0 }
 0x103   : > { %2967 = shalt.err (!%p2964_p10)
}
 0x104   : > { %s2968_s9 = scalar_lea.vmem %s3512_s19, 64  ;;  %s3140_s13 = smov [#allocation2]  }
 0x105   : > { %p2969_p12 = scmp.ne.s32.totalorder %s3512_s19, %s2968_s9  ;;  %s2973_s3 = sshll.u32 %s3140_s13, 4  ;;  %s2974_s3 = int_to_ptr.vmem [resolvable:$false] %s2973_s3 }
 0x106   : > { %s2975_s24 = scalar_lea.vmem %s2974_s3, 128  ;;  %p2976_p6 = scmp.lt.s32.totalorder %s3512_s19, %s2974_s3 }
 0x107   : > { %p2971_p13 = pnand %p2969_p12, %p2955_p8  ;;  %p2977_p1 = scmp.lt.s32.totalorder %s2975_s24, %s2968_s9 }
 0x109   : > { %p2972_p4 = pneg %p2971_p13  ;;  %p2978_p3 = por %p2977_p1, %p2976_p6 }
 0x10b   : > { %p2979_p2 = pnand %p2978_p3, %p2972_p4 }
 0x10d   : > { %2982 = shalt.err (!%p2979_p2)
}
 0x10e   : > { %2633 = dma.hbm_to_vmem [thread:$0]  (!%p3508_p11), %s3505_s22, 64, %s3512_s19, %s710_s5  }
 0x10f   : > { %s727_s11 = sand.u32 1, %s3131_s25   ;;  %s731_s23 = scalar_lea.vmem [#allocation5], %s3499_s0 }
 0x110   : > { %s738_s27 = sshll.u32 %s731_s23, 4  ;;  %s728_s28 = scalar_lea.sflag [#allocation6], %s727_s11  ;;  %s739_s27 = int_to_ptr.vmem [resolvable:$true] %s738_s27 }
 0x111   : > { %s2983_s20 = scalar_lea.hbm %s3517_s21, 64  ;;  %s2988_s13 = scalar_lea.hbm %s3981_s10, 128 }
 0x112   : > { %p2984_p6 = scmp.ne.s32.totalorder %s3517_s21, %s2983_s20  ;;  %p2989_p5 = scmp.lt.u32.totalorder %s3517_s21, %s3981_s10 }
 0x113   : > { %p2990_p9 = scmp.lt.u32.totalorder %s2988_s13, %s2983_s20  ;;  %p2992_p12 = scmp.lt.u32.totalorder %s2983_s20, %s3517_s21 }
 0x114   : > { %p2986_p4 = pnand %p2984_p6, %p2955_p8 }
 0x115   : > { %p2991_p10 = por %p2990_p9, %p2989_p5 }
 0x116   : > { %p2987_p0 = pneg %p2986_p4 }
 0x117   : > { %p2993_p13 = por %p2992_p12, %p2991_p10 }
 0x119   : > { %p2994_p1 = pnand %p2993_p13, %p2987_p0 }
 0x11b   : > { %2997 = shalt.err (!%p2994_p1)
}
 0x11c   : > { %s2998_s0 = scalar_lea.vmem %s739_s27, 64  ;;  %s3141_s22 = smov [#allocation5]  }
 0x11d   : > { %p2999_p3 = scmp.ne.s32.totalorder %s739_s27, %s2998_s0  ;;  %s3003_s19 = sshll.u32 %s3141_s22, 4  ;;  %s3004_s19 = int_to_ptr.vmem [resolvable:$false] %s3003_s19 }
 0x11e   : > { %s3005_s5 = scalar_lea.vmem %s3004_s19, 128  ;;  %p3006_p4 = scmp.lt.s32.totalorder %s739_s27, %s3004_s19 }
 0x11f   : > { %p3001_p2 = pnand %p2999_p3, %p2955_p8  ;;  %p3007_p7 = scmp.lt.s32.totalorder %s3005_s5, %s2998_s0 }
 0x121   : > { %p3002_p6 = pneg %p3001_p2  ;;  %p3008_p5 = por %p3007_p7, %p3006_p4 }
 0x123   : > { %p3009_p9 = pnand %p3008_p5, %p3002_p6 }
 0x125   : > { %3012 = shalt.err (!%p3009_p9)
}
 0x126   : > { %2636 = dma.hbm_to_vmem [thread:$0]  (!%p3508_p11), %s3517_s21, 64, %s739_s27, %s728_s28  }
 0x127   : > { %p3982_p0 = scmp.ne.s32.totalorder %s3964_s2, 0 }
 0x128   : > { %s3568_s11 = sand.u32 (!%p3982_p0), 1, %s3123_s30   ;;  %p3983_p8 = scmp.ne.s32.totalorder (!%p3982_p0), %s3976_s16, 0 }
 0x129   : > { %754 = sbr.rel (%p3982_p0) target bundleno = 4865 (0x1301), region = 108  ;;  %s2343_s23 = sshll.u32 (!%p3982_p0), %s3568_s11, 2 }
 0x12a   : > { %s757_s20 = scalar_lea.sflag (!%p3982_p0), [#allocation3], %s3568_s11  ;;  %s760_s7 = scalar_lea.vmem (!%p3982_p0), [#allocation2], %s2343_s23 }
 0x130   : > { %3086 = dma.done.wait (%p3983_p8), %s757_s20, 64  }
 0x131   : > { %3088 = vsyncadd (%p3983_p8), %s757_s20, 4294967232  ;;  %s765_s6 = sand.u32 1, %s3291_s26   ;;  %s769_s2 = scalar_lea.vmem [#allocation5], %s2343_s23 }
 0x132   : > { %s766_s21 = scalar_lea.sflag [#allocation6], %s765_s6 }
 0x133   : > { %3090 = dma.done.wait (%p3983_p8), %s766_s21, 64  }
 0x134   : > { %3092 = vsyncadd (%p3983_p8), %s766_s21, 4294967232  ;;  %p3984_p7 = scmp.eq.s32.totalorder %s3291_s26, 0 }
 0x136   : > { %3094 = dma.done.wait (%p3984_p7), [#allocation6], 128   ;;  %p3985_p11 = pmov %p3984_p7 }
 0x137   : > { %p3986_p10 = pmov %p3984_p7 }
 0x138   : > { %3096 = vsyncadd (%p3985_p11), [#allocation6], 4294967168 }
 0x139   : > { %3098 = dma.done.wait (%p3986_p10), [#allocation9], 64   ;;  %p3987_p12 = pmov %p3984_p7 }
 0x13a   : > { %p3988_p13 = pmov %p3984_p7 }
 0x13b   : > { %3100 = vsyncadd (%p3987_p12), [#allocation9], 4294967232 }
 0x13c   : > { %3102 = dma.done.wait (%p3988_p13), [#allocation12], 32   ;;  %p3989_p1 = pmov %p3984_p7 }
 0x13e   : > { %3104 = vsyncadd (%p3989_p1), [#allocation12], 4294967264  ;;  %p3990_p3 = pmov %p3989_p1 }
 0x13f   : > { %p3991_p2 = pmov %p3989_p1 }
 0x140   : > { %3106 = dma.done.wait (%p3990_p3), [#allocation15], 32  }
 0x141   : > { %3108 = vsyncadd (%p3991_p2), [#allocation15], 4294967264  ;;  %v878_v0 = vld [vmem:[%s760_s7] sm:$0xf]  ;;  %v880_v1 = vld [vmem:[%s769_s2] sm:$0xf]  ;;  %v927_v31 = vlaneseq }
 0x142   : > { %v883_v2 = vld [vmem:[#allocation7] sm:$0xff]  ;;  %v879_v3 = vunpack.c.l.bf16 %v878_v0  ;;  %v881_v4 = vunpack.c.l.bf16 %v880_v1  ;;  %vm887_vm0 = vcmask 261120   ;;  %s3992_s28 = sld [smem:[#allocation36_spill]]  ;;  %v3142_v15 = vmov 0.0   ;;  %s3993_s21 = sld [smem:[#allocation34_spill]] }
 0x143   : > { %2452 = vmatprep.subr.bf16.mxu1 %v3142_v15  ;;  %v3143_v18 = vmov 0   ;;  %vm3144_vm1 = vmmov 0   ;;  %v2355_v27 = vld [vmem:[#allocation8] ss:$0 sm:$0xff]  ;;  %v928_v32 = vshrl.u32 %v927_v31, 7  ;;  %vm1143_vm2 = vcmask 1043456  }
 0x144   : > { %v882_v5 = vadd.f32 %v881_v4, %v879_v3  ;;  %1009 = vmatprep.mubr.bf16.mxu0 %v3143_v18  ;;  %2456 = vmatprep.mubr.msk.bf16.mxu1 %vm3144_vm1, %v3142_v15  ;;  %v925_v34 = vld [vmem:[#allocation10] sm:$0x7]  ;;  %s3145_s2 = smov 96   ;;  %p873_p6 = scmp.lt.s32.totalorder %s3291_s26, 1  ;;  %vm1127_vm4 = vcmask 64512  }
 0x145   : > { %v937_v33 = vsub.s32 2, %v928_v32  ;;  %v933_v35 = vsub.s32 1, %v928_v32  ;;  %v929_v36 = vsub.s32 0, %v928_v32  ;;  %s3994_s3 = sld [smem:[#allocation33_spill]]  ;;  %s3146_s0 = smov 64   ;;  %v2713_v32 = vld [vmem:[%s3909_s8] sm:$0xff]  }
 0x146   : > { %v884_v6 = vadd.f32 %v883_v2, %v882_v5  ;;  %s874_s16 = scalar_select %p873_p6, %s3291_s26, 1 }
 0x147   : > { %v938_v37 = vrot.slane %v925_v34, %v937_v33  ;;  %v934_v38 = vrot.slane %v925_v34, %v933_v35  ;;  %v930_v39 = vrot.slane %v925_v34, %v929_v36  ;;  %v2714_v34 = vld [vmem:[%s3909_s8 + $0x8] sm:$0xff]   ;;  %s3996_s22 = sld [smem:[#allocation46_spill]]  ;;  %s4000_s5 = sld [smem:[#allocation47_spill]] }
 0x148   : > { %v888_v7 = vsel %vm887_vm0, %v884_v6, 0.0  ;;  %v2705_v13 = vld [vmem:[%s3992_s28 + $0x4] ss:$12 sps:$4 sm:$0xff]   ;;  %v2707_v14 = vld [vmem:[%s3992_s28] ss:$12 sps:$4 sm:$0xff]   ;;  %s2353_s27 = sshll.u32 %s874_s16, 3 }
 0x149   : > { %889 = vadd.xlane.f32.xlu0 %v888_v7  ;;  %v2708_v16 = vld [vmem:[%s3992_s28 + $0x8] ss:$12 sps:$4 sm:$0xff]   ;;  %977 = vmatprep.subr.bf16.mxu0 %v2705_v13  ;;  %v2711_v19 = vld [vmem:[%s3992_s28 + $0x18] ss:$12 sps:$4 sm:$0xff]   ;;  %v2712_v20 = vld [vmem:[%s3992_s28 + $0x20] ss:$12 sps:$4 sm:$0xff]  }
 0x14a   : > { %v2709_v17 = vld [vmem:[%s3992_s28 + $0x1c] ss:$12 sps:$4 sm:$0xff]   ;;  %978 = vmatpush1.bf16.msra.mxu0 %v2707_v14  ;;  %2453 = vmatpush3.bf16.msra.mxu1 %v2708_v16  ;;  %v2354_v25 = vld [vmem:[%s3993_s21] ss:$0 sm:$0xff]  ;;  %s3997_s21 = sld [smem:[#allocation42_spill]]  ;;  %s872_s23 = scalar_lea.vmem [#allocation18], %s3568_s11 }
 0x14b   : > { %979 = vmatprep.subr.bf16.mxu0 %v2709_v17  ;;  %2454 = vmatprep.subr.bf16.mxu1 %v3142_v15  ;;  %s876_s24 = scalar_lea.vmem %s3994_s3, %s2353_s27  ;;  %s3995_s3 = sld [smem:[#allocation44_spill]] }
 0x14c   : > { %v3662_v59 = vld [vmem:[%s876_s24] sm:$0xff]  ;;  %s3998_s27 = sld [smem:[#allocation43_spill]]  ;;  %s3999_s24 = sld [smem:[#allocation45_spill]] }
 0x14d   : > { %vm1062_vm3 = vcmp.gt.f32.partialorder %v3662_v59, 0.0  ;;  %s2406_s20 = sshll.u32 %s3291_s26, 4  ;;  %s2129_s7 = sshll.u32 %s872_s23, 4  ;;  %s2130_s7 = int_to_ptr.vmem [resolvable:$true] %s2129_s7 }
 0x14e   : > { %980 = vmatpush1.bf16.msra.mxu0 %v2711_v19  ;;  %2455 = vmatpush3.bf16.msra.mxu1 %v2712_v20  ;;  %s3013_s9 = scalar_lea.vmem %s2130_s7, 16  ;;  %p4002_p5 = scmp.ne.s32.totalorder %s3977_s1, 0 }
 0x14f   : > { %2466 = vmatprep.subr.bf16.mxu1 %v3142_v15  ;;  %2460 = vmatprep.subr.bf16.mxu0 %v3142_v15  ;;  %p3014_p4 = scmp.ne.s32.totalorder %s2130_s7, %s3013_s9  ;;  %s3148_s13 = smov [#allocation18]  }
 0x151   : > { %p3015_p9 = pnand %p3014_p4, %p4002_p5 }
 0x153   : > { %p3016_p0 = pneg %p3015_p9 }
 0x1d6   : > { %v890_v8 = vpop.xlane.xlu0 %889 }
 0x1d7   : > { %v892_v9 = vmul.f32 0.03125, %v890_v8 }
 0x1d9   : > { %v893_v10 = vsub.f32 %v884_v6, %v892_v9 }
 0x1db   : > { %v894_v11 = vmul.f32 %v893_v10, %v893_v10 }
 0x1dd   : > { %v895_v12 = vsel %vm887_vm0, %v894_v11, 0.0 }
 0x1de   : > { %896 = vadd.xlane.f32.xlu0 %v895_v12 }
 0x26b   : > { %v897_v21 = vpop.xlane.xlu0 %896 }
 0x26c   : > { %v898_v22 = vmul.f32 0.03125, %v897_v21 }
 0x26e   : > { %v899_v23 = vadd.f32 1e-05, %v898_v22 }
 0x270   : > { %2729 = vrsqrt.f32 %v899_v23 }
 0x27a   : > { %v2730_v24 = vpop.eup %2729 }
 0x27b   : > { %v901_v26 = vmul.f32 %v2730_v24, %v893_v10 }
 0x27d   : > { %v908_v28 = vmul.f32 %v2354_v25, %v901_v26  ;;  %v2715_v25 = vld [vmem:[%s3909_s8 + $0x10] sm:$0xff]   ;;  %v2716_v26 = vld [vmem:[%s3909_s8 + $0x18] sm:$0xff]  }
 0x27f   : > { %v915_v29 = vadd.f32 %v2355_v27, %v908_v28 }
 0x281   : > { %v916_v30 = vpack.c.bf16 %v915_v29, %v915_v29 }
 0x283   : > { %2362 = vmatmul.mubr.msk.bf16.vlgmr.msra.gmra.mrb[0].mxu0 %vm887_vm0, %v916_v30  ;;  %2457 = vmatmul.mubr.msk.bf16.vlgmr.msra.gmra.mrb[0].mxu1 %vm887_vm0, %v916_v30 }
 0x284   : > { %2462 = vmatprep.mubr.msk.bf16.mxu0 %vm3144_vm1, %v3142_v15  ;;  %2468 = vmatprep.mubr.msk.bf16.mxu1 %vm3144_vm1, %v3142_v15 }
 0x356   : > { %v1011_v40 = vpop.f32.mrb[0].mxu0  ;;  %v1052_v41 = vpop.f32.mrb[0].mxu1 }
 0x357   : > { %v1053_v42 = vadd.f32 %v1052_v41, %v938_v37  ;;  %v1013_v43 = vpop.f32.mrb[1].mxu0  ;;  %v2458_v44 = vpop.f32.mrb[1].mxu1  ;;  %v1012_v51 = vadd.f32 %v1011_v40, %v930_v39 }
 0x358   : > { %v1014_v45 = vadd.f32 %v1013_v43, %v934_v38  ;;  %v1015_v46 = vpop.f32.mrb[2].mxu0  ;;  %v1055_v47 = vpop.f32.mrb[2].mxu1 }
 0x359   : > { %v3632_v48 = vpack.c.bf16 %v1053_v42, %v1053_v42  ;;  %v1016_v49 = vpop.f32.mrb[3].mxu0  ;;  %v2459_v50 = vpop.f32.mrb[3].mxu1  ;;  %v3643_v55 = vpack.c.bf16 %v1012_v51, %v1012_v51 }
 0x35a   : > { %v3634_v52 = vpack.c.bf16 %v1014_v45, %v1014_v45 }
 0x35b   : > { %v1145_v53 = vsel %vm1143_vm2, %v3632_v48, 0 }
 0x35c   : > { %2467 = vmatpush3.bf16.msra.mxu1 %v1145_v53  ;;  %1192 = vrot.lane.b32.xlu1 %v3634_v52, %s3145_s2  ;;  %v1083_v54 = vsel %vm887_vm0, %v3634_v52, 0 }
 0x35d   : > { %2461 = vmatpush3.bf16.xpose.msra.mxu0 %v1083_v54  ;;  %2478 = vmatprep.subr.bf16.mxu1 %v3142_v15 }
 0x35e   : > { %2472 = vmatprep.subr.bf16.mxu0 %v3142_v15 }
 0x360   : > { %1189 = vrot.lane.b32.xlu1 %v3643_v55, %s3145_s2 }
 0x364   : > { %2463 = vmatmul.mubr.msk.bf16.vlgmr.msra.gmra.mrb[4].mxu0 %vm887_vm0, %v3643_v55 }
 0x365   : > { %2474 = vmatprep.mubr.msk.bf16.mxu0 %vm3144_vm1, %v3142_v15 }
 0x3ce   : > { %v1193_v56 = vpop.permute.xlu1 %1192 }
 0x3cf   : > { %v1198_v57 = vsel %vm887_vm0, %v1193_v56, 0 }
 0x3d0   : > { %2473 = vmatpush3.bf16.xpose.msra.mxu0 %v1198_v57 }
 0x3d1   : > { %2484 = vmatprep.subr.bf16.mxu0 %v3142_v15 }
 0x3d2   : > { %v1190_v58 = vpop.permute.xlu1 %1189 }
 0x3d7   : > { %2475 = vmatmul.mubr.msk.bf16.vlgmr.msra.gmra.mrb[8].mxu0 %vm887_vm0, %v1190_v58 }
 0x3d8   : > { %2488 = vmatprep.mubr.msk.bf16.mxu0 %vm3144_vm1, %v3142_v15  ;;  %2485 = vmatpush3.bf16.msra.mxu0 %v2715_v25 }
 0x3d9   : > { %2486 = vmatprep.subr.bf16.mxu0 %v3142_v15 }
 0x3dc   : > { %2487 = vmatpush3.bf16.msra.mxu0 %v2716_v26 }
 0x3dd   : > { %2500 = vmatprep.subr.bf16.mxu0 %v3142_v15 }
 0x437   : > { %v1119_v60 = vpop.f32.mrb[4].mxu0 }
 0x438   : > { %v1125_v61 = vmul.f32 0.35355338, %v1119_v60  ;;  %v2464_v62 = vpop.f32.mrb[5].mxu0 }
 0x439   : > { %v1122_v63 = vpop.f32.mrb[6].mxu0 }
 0x43a   : > { %v2465_v0 = vpop.f32.mrb[7].mxu0  ;;  %v1126_v1 = vsel %vm1062_vm3, -1e+09, %v1125_v61 }
 0x43b   : > { %v1128_v2 = vsel %vm1127_vm4, %v1126_v1, -inf }
 0x43c   : > { %1129 = vmax.xlane.f32.xlu0 %v1128_v2 }
 0x4aa   : > { %v1234_v3 = vpop.f32.mrb[8].mxu0 }
 0x4ab   : > { %v1240_v4 = vmul.f32 0.35355338, %v1234_v3  ;;  %v2476_v5 = vpop.f32.mrb[9].mxu0 }
 0x4ac   : > { %v1237_v6 = vpop.f32.mrb[10].mxu0 }
 0x4ad   : > { %v2477_v7 = vpop.f32.mrb[11].mxu0  ;;  %v1241_v8 = vsel %vm1062_vm3, -1e+09, %v1240_v4 }
 0x4ae   : > { %v1242_v9 = vsel %vm1127_vm4, %v1241_v8, -inf }
 0x4af   : > { %1243 = vmax.xlane.f32.xlu1 %v1242_v9 }
 0x4c0   : > { %1414 = vrot.lane.b32.xlu1 %v3643_v55, %s3146_s0 }
 0x4c9   : > { %v1130_v10 = vpop.xlane.xlu0 %1129 }
 0x4ca   : > { %v1131_v11 = vsub.f32 %v1126_v1, %v1130_v10 }
 0x4cc   : > { %v1132_v12 = vmul.f32 1.442695, %v1131_v11 }
 0x4ce   : > { %2731 = vpow2.f32 %v1132_v12 }
 0x4d8   : > { %v2732_v13 = vpop.eup %2731 }
 0x4d9   : > { %v1134_v14 = vsel %vm1127_vm4, %v2732_v13, 0.0 }
 0x4da   : > { %1135 = vadd.xlane.f32.xlu0 %v1134_v14 }
 0x53c   : > { %v1244_v16 = vpop.xlane.xlu1 %1243 }
 0x53d   : > { %v1245_v17 = vsub.f32 %v1241_v8, %v1244_v16 }
 0x53f   : > { %v1246_v18 = vmul.f32 1.442695, %v1245_v17 }
 0x540   : > { %v1415_v47 = vpop.permute.xlu1 %1414 }
 0x541   : > { %2733 = vpow2.f32 %v1246_v18  ;;  %v2718_v18 = vld [vmem:[%s3909_s8 + $0x28] sm:$0xff]  }
 0x54b   : > { %v2734_v19 = vpop.eup %2733 }
 0x54c   : > { %v1248_v20 = vsel %vm1127_vm4, %v2734_v19, 0.0 }
 0x54d   : > { %1249 = vadd.xlane.f32.xlu0 %v1248_v20 }
 0x563   : > { %1255 = vrot.lane.b32.xlu0 %v3632_v48, %s3145_s2  ;;  %s3147_s2 = smov 32  }
 0x567   : > { %v1136_v21 = vpop.xlane.xlu0 %1135  ;;  %1416 = vrot.lane.b32.xlu0 %v3634_v52, %s3146_s0 }
 0x568   : > { %2735 = vrcp.f32 %v1136_v21 }
 0x572   : > { %v2736_v22 = vpop.eup %2735 }
 0x573   : > { %v1138_v23 = vmul.f32 %v2736_v22, %v2732_v13 }
 0x575   : > { %v1139_v24 = vpack.c.bf16 %v1138_v23, %v1138_v23 }
 0x577   : > { %2469 = vmatmul.mubr.msk.bf16.vlgmr.msra.gmra.mrb[4].mxu1 %vm1127_vm4, %v1139_v24 }
 0x578   : > { %2480 = vmatprep.mubr.msk.bf16.mxu1 %vm3144_vm1, %v3142_v15 }
 0x5da   : > { %v1250_v27 = vpop.xlane.xlu0 %1249 }
 0x5db   : > { %2737 = vrcp.f32 %v1250_v27 }
 0x5de   : > { %v1256_v28 = vpop.permute.xlu0 %1255 }
 0x5df   : > { %v1261_v29 = vsel %vm1143_vm2, %v1256_v28, 0 }
 0x5e0   : > { %2479 = vmatpush3.bf16.msra.mxu1 %v1261_v29 }
 0x5e1   : > { %2492 = vmatprep.subr.bf16.mxu1 %v3142_v15 }
 0x5e2   : > { %v1417_v40 = vpop.permute.xlu0 %1416 }
 0x5e3   : > { %v1422_v45 = vsel %vm887_vm0, %v1417_v40, 0 }
 0x5e5   : > { %v2738_v30 = vpop.eup %2737 }
 0x5e6   : > { %v1252_v31 = vmul.f32 %v2738_v30, %v2734_v19 }
 0x5e8   : > { %v1253_v33 = vpack.c.bf16 %v1252_v31, %v1252_v31 }
 0x5ea   : > { %2481 = vmatmul.mubr.msk.bf16.vlgmr.msra.gmra.mrb[8].mxu1 %vm1127_vm4, %v1253_v33 }
 0x5eb   : > { %2493 = vmatpush3.bf16.msra.mxu1 %v2713_v32  ;;  %2496 = vmatprep.mubr.msk.bf16.mxu1 %vm3144_vm1, %v3142_v15 }
 0x5ec   : > { %2494 = vmatprep.subr.bf16.mxu1 %v3142_v15 }
 0x5ef   : > { %2495 = vmatpush3.bf16.msra.mxu1 %v2714_v34 }
 0x5f0   : > { %2506 = vmatprep.subr.bf16.mxu1 %v3142_v15 }
 0x64a   : > { %v1181_v35 = vpop.f32.mrb[4].mxu1 }
 0x64b   : > { %v1187_v36 = vpack.c.bf16 %v1181_v35, %v1181_v35  ;;  %v2470_v37 = vpop.f32.mrb[5].mxu1 }
 0x64c   : > { %v1184_v38 = vpop.f32.mrb[6].mxu1  ;;  %v2719_v37 = vld [vmem:[%s3909_s8 + $0x30] sm:$0xff]  }
 0x64d   : > { %v2471_v39 = vpop.f32.mrb[7].mxu1  ;;  %2497 = vmatmul.mubr.msk.bf16.vlgmr.msra.gmra.mrb[12].mxu1 %vm887_vm0, %v1187_v36 }
 0x64e   : > { %2508 = vmatprep.mubr.msk.bf16.mxu1 %vm3144_vm1, %v3142_v15 }
 0x6bd   : > { %v1297_v41 = vpop.f32.mrb[8].mxu1 }
 0x6be   : > { %v1303_v42 = vpack.c.bf16 %v1297_v41, %v1297_v41  ;;  %v2482_v43 = vpop.f32.mrb[9].mxu1 }
 0x6bf   : > { %v1300_v44 = vpop.f32.mrb[10].mxu1 }
 0x6c0   : > { %v2483_v46 = vpop.f32.mrb[11].mxu1  ;;  %2489 = vmatmul.mubr.msk.bf16.vlgmr.msra.gmra.mrb[12].mxu0 %vm887_vm0, %v1303_v42 }
 0x6c1   : > { %2501 = vmatpush3.bf16.xpose.msra.mxu0 %v1422_v45  ;;  %2502 = vmatprep.mubr.msk.bf16.mxu0 %vm3144_vm1, %v3142_v15  ;;  %v2720_v46 = vld [vmem:[%s3909_s8 + $0x38] sm:$0xff]  }
 0x6c2   : > { %2512 = vmatprep.subr.bf16.mxu0 %v3142_v15 }
 0x6c8   : > { %2503 = vmatmul.mubr.msk.bf16.vlgmr.msra.gmra.mrb[16].mxu0 %vm887_vm0, %v1415_v47 }
 0x6c9   : > { %2516 = vmatprep.mubr.msk.bf16.mxu0 %vm3144_vm1, %v3142_v15 }
 0x720   : > { %v1408_v49 = vpop.f32.mrb[12].mxu1 }
 0x721   : > { %v2498_v50 = vpop.f32.mrb[13].mxu1 }
 0x722   : > { %v1411_v51 = vpop.f32.mrb[14].mxu1 }
 0x723   : > { %v2499_v53 = vpop.f32.mrb[15].mxu1 }
 0x793   : > { %v1353_v54 = vpop.f32.mrb[12].mxu0 }
 0x794   : > { %v3714_v56 = vadd.f32 %v1408_v49, %v1353_v54  ;;  %v2490_v57 = vpop.f32.mrb[13].mxu0 }
 0x795   : > { %v1356_v58 = vpop.f32.mrb[14].mxu0 }
 0x796   : > { %v2491_v60 = vpop.f32.mrb[15].mxu0 }
 0x79b   : > { %v1458_v61 = vpop.f32.mrb[16].mxu0 }
 0x79c   : > { %v1464_v62 = vmul.f32 0.35355338, %v1458_v61  ;;  %v2504_v63 = vpop.f32.mrb[17].mxu0 }
 0x79d   : > { %v1461_v0 = vpop.f32.mrb[18].mxu0 }
 0x79e   : > { %v2505_v1 = vpop.f32.mrb[19].mxu0  ;;  %v1465_v2 = vsel %vm1062_vm3, -1e+09, %v1464_v62 }
 0x79f   : > { %v1466_v3 = vsel %vm1127_vm4, %v1465_v2, -inf }
 0x7a0   : > { %1467 = vmax.xlane.f32.xlu0 %v1466_v3 }
 0x7b6   : > { %1478 = vrot.lane.b32.xlu0 %v3632_v48, %s3146_s0 }
 0x7ba   : > { %1583 = vrot.lane.b32.xlu0 %v3643_v55, %s3147_s2  ;;  %v2717_v55 = vld [vmem:[%s3909_s8 + $0x20] sm:$0xff]  }
 0x7bb   : > { %2513 = vmatpush3.bf16.msra.mxu0 %v2717_v55  ;;  %v2385_v55 = vld [vmem:[#allocation13] ss:$0 sm:$0xff] }
 0x7bc   : > { %2514 = vmatprep.subr.bf16.mxu0 %v3142_v15 }
 0x7bf   : > { %2515 = vmatpush3.bf16.msra.mxu0 %v2718_v18  ;;  %v2387_v18 = vld [vmem:[#allocation16] ss:$0 sm:$0xff] }
 0x7c0   : > { %2526 = vmatprep.subr.bf16.mxu0 %v3142_v15 }
 0x82d   : > { %v1468_v4 = vpop.xlane.xlu0 %1467 }
 0x82e   : > { %v1469_v5 = vsub.f32 %v1465_v2, %v1468_v4 }
 0x830   : > { %v1470_v6 = vmul.f32 1.442695, %v1469_v5  ;;  %v2721_v5 = vld [vmem:[%s3913_s12] sm:$0xff]  }
 0x831   : > { %v1479_v7 = vpop.permute.xlu0 %1478 }
 0x832   : > { %2739 = vpow2.f32 %v1470_v6  ;;  %v1484_v8 = vsel %vm1143_vm2, %v1479_v7, 0  ;;  %v2722_v6 = vld [vmem:[%s3913_s12 + $0x8] sm:$0xff]  }
 0x833   : > { %2507 = vmatpush3.bf16.msra.mxu1 %v1484_v8 }
 0x834   : > { %2520 = vmatprep.subr.bf16.mxu1 %v3142_v15 }
 0x83c   : > { %v2740_v9 = vpop.eup %2739 }
 0x83d   : > { %v1472_v10 = vsel %vm1127_vm4, %v2740_v9, 0.0 }
 0x83e   : > { %1473 = vadd.xlane.f32.xlu1 %v1472_v10 }
 0x84f   : > { %1585 = vrot.lane.b32.xlu1 %v3634_v52, %s3147_s2  ;;  %v1584_v52 = vpop.permute.xlu0 %1583 }
 0x8cb   : > { %v1474_v11 = vpop.xlane.xlu1 %1473 }
 0x8cc   : > { %2741 = vrcp.f32 %v1474_v11 }
 0x8cf   : > { %v1586_v14 = vpop.permute.xlu1 %1585 }
 0x8d0   : > { %v1591_v17 = vsel %vm887_vm0, %v1586_v14, 0 }
 0x8d6   : > { %v2742_v12 = vpop.eup %2741 }
 0x8d7   : > { %v1476_v13 = vmul.f32 %v2742_v12, %v2740_v9  ;;  %v2386_v12 = vld [vmem:[#allocation14] ss:$0 sm:$0xff] }
 0x8d9   : > { %v1477_v16 = vpack.c.bf16 %v1476_v13, %v1476_v13 }
 0x8db   : > { %2509 = vmatmul.mubr.msk.bf16.vlgmr.msra.gmra.mrb[16].mxu1 %vm1127_vm4, %v1477_v16 }
 0x8dc   : > { %2521 = vmatpush3.bf16.xpose.msra.mxu1 %v1591_v17  ;;  %2522 = vmatprep.mubr.msk.bf16.mxu1 %vm3144_vm1, %v3142_v15  ;;  %v2723_v17 = vld [vmem:[%s3915_s14] sm:$0xff]  }
 0x8dd   : > { %2532 = vmatprep.subr.bf16.mxu1 %v3142_v15 }
 0x8e3   : > { %2523 = vmatmul.mubr.msk.bf16.vlgmr.msra.gmra.mrb[20].mxu1 %vm887_vm0, %v1584_v52  ;;  %v2724_v52 = vld [vmem:[%s3915_s14 + $0x8] sm:$0xff]  }
 0x8e4   : > { %2536 = vmatprep.mubr.msk.bf16.mxu1 %vm3144_vm1, %v3142_v15  ;;  %2533 = vmatpush3.bf16.msra.mxu1 %v2719_v37 }
 0x8e5   : > { %2534 = vmatprep.subr.bf16.mxu1 %v3142_v15 }
 0x8e8   : > { %2535 = vmatpush3.bf16.msra.mxu1 %v2720_v46  ;;  %v2727_v46 = vld [vmem:[%s3995_s3 + $0x8] sm:$0xff]  }
 0x8e9   : > { %2548 = vmatprep.subr.bf16.mxu1 %v3142_v15 }
 0x9ae   : > { %v1520_v19 = vpop.f32.mrb[16].mxu1 }
 0x9af   : > { %v1526_v20 = vpack.c.bf16 %v1520_v19, %v1520_v19  ;;  %v2510_v21 = vpop.f32.mrb[17].mxu1 }
 0x9b0   : > { %v1523_v22 = vpop.f32.mrb[18].mxu1 }
 0x9b1   : > { %v2511_v23 = vpop.f32.mrb[19].mxu1  ;;  %2517 = vmatmul.mubr.msk.bf16.vlgmr.msra.gmra.mrb[20].mxu0 %vm887_vm0, %v1526_v20 }
 0x9b2   : > { %2528 = vmatprep.mubr.msk.bf16.mxu0 %vm3144_vm1, %v3142_v15 }
 0x9b6   : > { %v1627_v24 = vpop.f32.mrb[20].mxu1 }
 0x9b7   : > { %v1633_v25 = vmul.f32 0.35355338, %v1627_v24  ;;  %v2524_v26 = vpop.f32.mrb[21].mxu1 }
 0x9b8   : > { %v1630_v27 = vpop.f32.mrb[22].mxu1 }
 0x9b9   : > { %v2525_v28 = vpop.f32.mrb[23].mxu1  ;;  %v1634_v29 = vsel %vm1062_vm3, -1e+09, %v1633_v25 }
 0x9ba   : > { %v1635_v30 = vsel %vm1127_vm4, %v1634_v29, -inf }
 0x9bb   : > { %1636 = vmax.xlane.f32.xlu0 %v1635_v30 }
 0x9d1   : > { %1647 = vrot.lane.b32.xlu0 %v3632_v48, %s3147_s2  ;;  %s4001_s2 = sld [smem:[#allocation49_spill]] }
 0x9d7   : > { %s3832_s16 = scalar_lea.hbm %s4001_s2, %s2406_s20 }
 0xa48   : > { %v1637_v31 = vpop.xlane.xlu0 %1636 }
 0xa49   : > { %v1638_v32 = vsub.f32 %v1634_v29, %v1637_v31 }
 0xa4b   : > { %v1639_v33 = vmul.f32 1.442695, %v1638_v32 }
 0xa4c   : > { %v1648_v34 = vpop.permute.xlu0 %1647 }
 0xa4d   : > { %2743 = vpow2.f32 %v1639_v33  ;;  %v1653_v35 = vsel %vm1143_vm2, %v1648_v34, 0  ;;  %v2391_v34 = vld [vmem:[%s3916_s15] ss:$0 sm:$0xff] }
 0xa4e   : > { %2527 = vmatpush3.bf16.msra.mxu0 %v1653_v35 }
 0xa4f   : > { %2540 = vmatprep.subr.bf16.mxu0 %v3142_v15 }
 0xa57   : > { %v2744_v36 = vpop.eup %2743 }
 0xa58   : > { %v1641_v59 = vsel %vm1127_vm4, %v2744_v36, 0.0 }
 0xa59   : > { %1642 = vadd.xlane.f32.xlu1 %v1641_v59 }
 0xa84   : > { %v1576_v48 = vpop.f32.mrb[20].mxu0 }
 0xa85   : > { %v1582_v38 = vadd.f32 %v1576_v48, %v3714_v56  ;;  %v2518_v39 = vpop.f32.mrb[21].mxu0  ;;  %v2384_v56 = vld [vmem:[#allocation11] ss:$0 sm:$0xff] }
 0xa86   : > { %v1579_v40 = vpop.f32.mrb[22].mxu0 }
 0xa87   : > { %v2519_v41 = vpop.f32.mrb[23].mxu0 }
 0xae6   : > { %v1643_v42 = vpop.xlane.xlu1 %1642 }
 0xae7   : > { %2745 = vrcp.f32 %v1643_v42 }
 0xaf1   : > { %v2746_v43 = vpop.eup %2745 }
 0xaf2   : > { %v1645_v44 = vmul.f32 %v2746_v43, %v2744_v36 }
 0xaf4   : > { %v1646_v45 = vpack.c.bf16 %v1645_v44, %v1645_v44  ;;  %v2725_v44 = vld [vmem:[%s3995_s3] sm:$0xff]  }
 0xaf6   : > { %2529 = vmatmul.mubr.msk.bf16.vlgmr.msra.gmra.mrb[24].mxu0 %vm1127_vm4, %v1646_v45  ;;  %v2726_v45 = vld [vmem:[%s3996_s22] sm:$0xff]  }
 0xaf7   : > { %2544 = vmatprep.mubr.msk.bf16.mxu0 %vm3144_vm1, %v3142_v15  ;;  %2541 = vmatpush3.bf16.msra.mxu0 %v2721_v5 }
 0xaf8   : > { %2542 = vmatprep.subr.bf16.mxu0 %v3142_v15 }
 0xafb   : > { %2543 = vmatpush3.bf16.msra.mxu0 %v2722_v6 }
 0xafc   : > { %2556 = vmatprep.subr.bf16.mxu0 %v3142_v15 }
 0xbc9   : > { %v1689_v47 = vpop.f32.mrb[24].mxu0 }
 0xbca   : > { %v1695_v49 = vpack.c.bf16 %v1689_v47, %v1689_v47  ;;  %v2530_v50 = vpop.f32.mrb[25].mxu0  ;;  %v2728_v47 = vld [vmem:[%s3996_s22 + $0x8] sm:$0xff]  }
 0xbcb   : > { %v1692_v51 = vpop.f32.mrb[26].mxu0 }
 0xbcc   : > { %v2531_v53 = vpop.f32.mrb[27].mxu0  ;;  %2537 = vmatmul.mubr.msk.bf16.vlgmr.msra.gmra.mrb[24].mxu1 %vm887_vm0, %v1695_v49 }
 0xbcd   : > { %2552 = vmatprep.mubr.msk.bf16.mxu1 %vm3144_vm1, %v3142_v15  ;;  %2549 = vmatpush3.bf16.msra.mxu1 %v2723_v17 }
 0xbce   : > { %2550 = vmatprep.subr.bf16.mxu1 %v3142_v15 }
 0xbd1   : > { %2551 = vmatpush3.bf16.msra.mxu1 %v2724_v52 }
 0xbd2   : > { %2564 = vmatprep.subr.bf16.mxu1 %v3142_v15 }
 0xc9f   : > { %v1745_v54 = vpop.f32.mrb[24].mxu1 }
 0xca0   : > { %v1751_v57 = vadd.f32 %v1745_v54, %v1582_v38  ;;  %v2538_v58 = vpop.f32.mrb[25].mxu1  ;;  %v2395_v54 = vld [vmem:[%s3997_s21] ss:$0 sm:$0xff] }
 0xca1   : > { %v1748_v60 = vpop.f32.mrb[26].mxu1 }
 0xca2   : > { %v2539_v61 = vpop.f32.mrb[27].mxu1  ;;  %v1759_v62 = vadd.f32 %v2384_v56, %v1751_v57  ;;  %v2396_v57 = vld [vmem:[%s3998_s27] ss:$0 sm:$0xff]  ;;  %s2104_s27 = scalar_lea.sflag [#allocation19], %s3568_s11 }
 0xca3   : > { %v2397_v61 = vld [vmem:[%s3999_s24] ss:$0 sm:$0xff]  ;;  %s3017_s24 = sshll.u32 %s3148_s13, 4  ;;  %s3018_s24 = int_to_ptr.vmem [resolvable:$false] %s3017_s24 }
 0xca4   : > { %v1762_v63 = vsel %vm887_vm0, %v1759_v62, 0.0  ;;  %s3019_s0 = scalar_lea.vmem %s3018_s24, 32  ;;  %p3020_p8 = scmp.lt.s32.totalorder %s2130_s7, %s3018_s24 }
 0xca5   : > { %1763 = vadd.xlane.f32.xlu1 %v1762_v63  ;;  %p3021_p7 = scmp.lt.s32.totalorder %s3019_s0, %s3013_s9 }
 0xca7   : > { %p3022_p11 = por %p3021_p7, %p3020_p8 }
 0xca9   : > { %p3023_p10 = pnand %p3022_p11, %p3016_p0 }
 0xd32   : > { %v1764_v0 = vpop.xlane.xlu1 %1763 }
 0xd33   : > { %v1765_v1 = vmul.f32 0.03125, %v1764_v0 }
 0xd35   : > { %v1766_v2 = vsub.f32 %v1759_v62, %v1765_v1  ;;  %v2044_v62 = vld [vmem:[%s4000_s5] sm:$0x1] }
 0xd37   : > { %v1767_v3 = vmul.f32 %v1766_v2, %v1766_v2 }
 0xd39   : > { %v1768_v4 = vsel %vm887_vm0, %v1767_v3, 0.0 }
 0xd3a   : > { %1769 = vadd.xlane.f32.xlu1 %v1768_v4 }
 0xdc7   : > { %v1770_v7 = vpop.xlane.xlu1 %1769 }
 0xdc8   : > { %v1771_v8 = vmul.f32 0.03125, %v1770_v7 }
 0xdca   : > { %v1772_v9 = vadd.f32 1e-05, %v1771_v8 }
 0xdcc   : > { %2747 = vrsqrt.f32 %v1772_v9 }
 0xdd6   : > { %v2748_v10 = vpop.eup %2747 }
 0xdd7   : > { %v1774_v11 = vmul.f32 %v2748_v10, %v1766_v2 }
 0xdd9   : > { %v1781_v13 = vmul.f32 %v2385_v55, %v1774_v11 }
 0xddb   : > { %v1788_v14 = vadd.f32 %v2386_v12, %v1781_v13 }
 0xddd   : > { %v1789_v16 = vpack.c.bf16 %v1788_v14, %v1788_v14 }
 0xddf   : > { %2545 = vmatmul.mubr.msk.bf16.vlgmr.msra.gmra.mrb[28].mxu0 %vm887_vm0, %v1789_v16 }
 0xde0   : > { %2560 = vmatprep.mubr.msk.bf16.mxu0 %vm3144_vm1, %v3142_v15  ;;  %2557 = vmatpush3.bf16.msra.mxu0 %v2725_v44 }
 0xde1   : > { %2558 = vmatprep.subr.bf16.mxu0 %v3142_v15 }
 0xde4   : > { %2559 = vmatpush3.bf16.msra.mxu0 %v2727_v46 }
 0xeb2   : > { %v1850_v19 = vpop.f32.mrb[28].mxu0 }
 0xeb3   : > { %v1851_v20 = vadd.f32 %v2387_v18, %v1850_v19  ;;  %v2546_v21 = vpop.f32.mrb[29].mxu0 }
 0xeb4   : > { %v1853_v22 = vpop.f32.mrb[30].mxu0 }
 0xeb5   : > { %v1857_v23 = vmul.f32 0.044715, %v1851_v20  ;;  %v2547_v24 = vpop.f32.mrb[31].mxu0  ;;  %v1856_v30 = vmul.f32 0.5, %v1851_v20 }
 0xeb7   : > { %v1858_v25 = vmul.f32 %v1857_v23, %v1851_v20 }
 0xeb9   : > { %v1859_v26 = vmul.f32 %v1858_v25, %v1851_v20 }
 0xebb   : > { %v1860_v27 = vadd.f32 %v1859_v26, %v1851_v20 }
 0xebd   : > { %v1861_v28 = vmul.f32 0.7978846, %v1860_v27 }
 0xebf   : > { %2749 = vtanh.f32 %v1861_v28 }
 0xec9   : > { %v2750_v29 = vpop.eup %2749 }
 0xeca   : > { %v1863_v31 = vadd.f32 1.0, %v2750_v29 }
 0xecc   : > { %v1864_v32 = vmul.f32 %v1863_v31, %v1856_v30 }
 0xece   : > { %v1865_v33 = vpack.c.bf16 %v1864_v32, %v1864_v32 }
 0xed0   : > { %2553 = vmatmul.mubr.msk.bf16.vlgmr.msra.gmra.mrb[28].mxu1 %vm887_vm0, %v1865_v33 }
 0xed1   : > { %2568 = vmatprep.mubr.msk.bf16.mxu1 %vm3144_vm1, %v3142_v15  ;;  %2565 = vmatpush3.bf16.msra.mxu1 %v2726_v45 }
 0xed2   : > { %2566 = vmatprep.subr.bf16.mxu1 %v3142_v15 }
 0xed5   : > { %2567 = vmatpush3.bf16.msra.mxu1 %v2728_v47 }
 0xfa3   : > { %v1926_v35 = vpop.f32.mrb[28].mxu1 }
 0xfa4   : > { %v1927_v36 = vadd.f32 %v2391_v34, %v1926_v35  ;;  %v2554_v59 = vpop.f32.mrb[29].mxu1 }
 0xfa5   : > { %v1929_v37 = vpop.f32.mrb[30].mxu1 }
 0xfa6   : > { %v2555_v48 = vpop.f32.mrb[31].mxu1  ;;  %v1934_v38 = vsel %vm887_vm0, %v1927_v36, 0.0 }
 0xfa7   : > { %1935 = vadd.xlane.f32.xlu0 %v1934_v38 }
0x1034   : > { %v1936_v39 = vpop.xlane.xlu0 %1935 }
0x1035   : > { %v1937_v40 = vmul.f32 0.03125, %v1936_v39 }
0x1037   : > { %v1938_v41 = vsub.f32 %v1927_v36, %v1937_v40 }
0x1039   : > { %v1939_v42 = vmul.f32 %v1938_v41, %v1938_v41 }
0x103b   : > { %v1940_v43 = vsel %vm887_vm0, %v1939_v42, 0.0 }
0x103c   : > { %1941 = vadd.xlane.f32.xlu1 %v1940_v43 }
0x10c9   : > { %v1942_v49 = vpop.xlane.xlu1 %1941 }
0x10ca   : > { %v1943_v50 = vmul.f32 0.03125, %v1942_v49 }
0x10cc   : > { %v1944_v51 = vadd.f32 1e-05, %v1943_v50 }
0x10ce   : > { %2751 = vrsqrt.f32 %v1944_v51 }
0x10d8   : > { %v2752_v53 = vpop.eup %2751 }
0x10d9   : > { %v1946_v56 = vmul.f32 %v2752_v53, %v1938_v41 }
0x10db   : > { %v1953_v58 = vmul.f32 %v2395_v54, %v1946_v56 }
0x10dd   : > { %v1960_v60 = vadd.f32 %v2396_v57, %v1953_v58 }
0x10df   : > { %v1961_v15 = vpack.c.bf16 %v1960_v60, %v1960_v60 }
0x10e1   : > { %2561 = vmatmul.mubr.msk.bf16.vlgmr.msra.gmra.mrb[32].mxu0 %vm887_vm0, %v1961_v15  ;;  %2569 = vmatmul.mubr.msk.bf16.vlgmr.msra.gmra.mrb[32].mxu1 %vm887_vm0, %v1961_v15 }
0x11b4   : > { %v2022_v63 = vpop.f32.mrb[32].mxu0  ;;  %v2091_v0 = vpop.f32.mrb[32].mxu1 }
0x11b5   : > { %v2023_v1 = vadd.f32 %v2397_v61, %v2022_v63  ;;  %v2092_v2 = vadd.f32 %v2091_v0, %v2044_v62  ;;  %v2562_v3 = vpop.f32.mrb[33].mxu0  ;;  %v2570_v4 = vpop.f32.mrb[33].mxu1 }
0x11b6   : > { %v2025_v5 = vpop.f32.mrb[34].mxu0  ;;  %v2094_v6 = vpop.f32.mrb[34].mxu1 }
0x11b7   : > { %2097 = vst [vmem:[%s872_s23] sm:$0x1] %v2092_v2  ;;  %v2571_v7 = vpop.f32.mrb[35].mxu1  ;;  %2028 = vmax.xlane.f32.xlu1 %v2023_v1  ;;  %v2563_v8 = vpop.f32.mrb[35].mxu0 }
0x1244   : > { %v2029_v9 = vpop.xlane.xlu1 %2028 }
0x1245   : > { %v2030_v10 = vsub.f32 %v2023_v1, %v2029_v9 }
0x1247   : > { %v2031_v55 = vmul.f32 1.442695, %v2030_v10 }
0x1249   : > { %2753 = vpow2.f32 %v2031_v55 }
0x1253   : > { %v2754_v11 = vpop.eup %2753 }
0x1254   : > { %2033 = vadd.xlane.f32.xlu1 %v2754_v11 }
0x1255   : > { %3026 = shalt.err (!%p3023_p10)
}
0x1256   : > { %s3027_s19 = scalar_lea.hbm %s3832_s16, 16  ;;  %s3031_s20 = scalar_lea.hbm %s4001_s2, 32 }
0x1257   : > { %p3028_p12 = scmp.ne.s32.totalorder %s3832_s16, %s3027_s19  ;;  %p3032_p3 = scmp.lt.u32.totalorder %s3832_s16, %s4001_s2 }
0x1258   : > { %p3033_p2 = scmp.lt.u32.totalorder %s3031_s20, %s3027_s19  ;;  %p3035_p4 = scmp.lt.u32.totalorder %s3027_s19, %s3832_s16 }
0x1259   : > { %p3029_p13 = pnand %p3028_p12, %p4002_p5 }
0x125a   : > { %p3034_p6 = por %p3033_p2, %p3032_p3 }
0x125b   : > { %p3030_p1 = pneg %p3029_p13 }
0x125c   : > { %p3036_p9 = por %p3035_p4, %p3034_p6 }
0x125e   : > { %p3037_p0 = pnand %p3036_p9, %p3030_p1 }
0x1260   : > { %3040 = shalt.err (!%p3037_p0)
}
0x1261   : > { %2605 = dma.vmem_to_hbm [thread:$0]  (%p4002_p5), %s2130_s7, 16, %s3832_s16, %s2104_s27  }
0x1262   : > { %s2352_s9 = sshll.u32 %s3568_s11, 3  ;;  %s2405_s13 = sshll.u32 %s3291_s26, 7 }
0x1263   : > { %s866_s24 = scalar_lea.vmem [#allocation17], %s2352_s9  ;;  %s4003_s23 = sld [smem:[#allocation48_spill]] }
0x1264   : > { %s2116_s0 = sshll.u32 %s866_s24, 4  ;;  %s2099_s7 = scalar_lea.sflag [#allocation4], %s3568_s11  ;;  %s3859_s0 = int_to_ptr.vmem [resolvable:$true] %s2116_s0 }
0x1265   : > { %s3041_s16 = scalar_lea.vmem %s3859_s0, 128  ;;  %s3149_s26 = smov [#allocation17]  }
0x1266   : > { %p3042_p8 = scmp.ne.s32.totalorder %s3859_s0, %s3041_s16  ;;  %s3045_s27 = sshll.u32 %s3149_s26, 4  ;;  %s3046_s27 = int_to_ptr.vmem [resolvable:$false] %s3045_s27 }
0x1267   : > { %s3047_s6 = scalar_lea.vmem %s3046_s27, 256  ;;  %p3048_p10 = scmp.lt.s32.totalorder %s3859_s0, %s3046_s27 }
0x1268   : > { %p3043_p7 = pnand %p3042_p8, %p4002_p5  ;;  %p3049_p12 = scmp.lt.s32.totalorder %s3047_s6, %s3041_s16 }
0x1269   : > { %s3857_s20 = scalar_lea.hbm %s4003_s23, %s2405_s13 }
0x126a   : > { %p3044_p11 = pneg %p3043_p7  ;;  %p3050_p13 = por %p3049_p12, %p3048_p10 }
0x126c   : > { %p3051_p1 = pnand %p3050_p13, %p3044_p11 }
0x12e1   : > { %v2034_v12 = vpop.xlane.xlu1 %2033 }
0x12e2   : > { %2755 = vlog2.f32 %v2034_v12 }
0x12ec   : > { %v2756_v13 = vpop.eup %2755 }
0x12ed   : > { %v2036_v14 = vmul.f32 0.6931472, %v2756_v13 }
0x12ef   : > { %v2037_v16 = vadd.f32 %v2036_v14, %v2029_v9 }
0x12f1   : > { %v2038_v17 = vsub.f32 %v2023_v1, %v2037_v16 }
0x12f3   : > { %2039 = vst [vmem:[%s866_s24] sm:$0xff] %v2038_v17 }
0x12f4   : > { %3054 = shalt.err (!%p3051_p1)
}
0x12f5   : > { %s3055_s11 = scalar_lea.hbm %s3857_s20, 128  ;;  %s3059_s13 = scalar_lea.hbm %s4003_s23, 256 }
0x12f6   : > { %p3056_p3 = scmp.ne.s32.totalorder %s3857_s20, %s3055_s11  ;;  %p3060_p4 = scmp.lt.u32.totalorder %s3857_s20, %s4003_s23 }
0x12f7   : > { %p3061_p9 = scmp.lt.u32.totalorder %s3059_s13, %s3055_s11  ;;  %p3063_p8 = scmp.lt.u32.totalorder %s3055_s11, %s3857_s20 }
0x12f8   : > { %p3057_p2 = pnand %p3056_p3, %p4002_p5 }
0x12f9   : > { %p3062_p0 = por %p3061_p9, %p3060_p4 }
0x12fa   : > { %p3058_p6 = pneg %p3057_p2 }
0x12fb   : > { %p3064_p7 = por %p3063_p8, %p3062_p0 }
0x12fd   : > { %p3065_p11 = pnand %p3064_p7, %p3058_p6 }
0x12ff   : > { %3068 = shalt.err (!%p3065_p11)
}
0x1300   : > { %2604 = dma.vmem_to_hbm [thread:$0]  (%p4002_p5), %s3859_s0, 128, %s3857_s20, %s2099_s7  }
0x1301 PF: > { %s2141_s5 = sand.u32 1, %s3119_s4   ;;  %p4004_p10 = scmp.ne.s32.totalorder %s3978_s18, 0 }
0x1302   : > { %p4005_p12 = scmp.ge.s32.totalorder %s3131_s25, 2  ;;  %s2142_s16 = scalar_lea.sflag [#allocation4], %s2141_s5 }
0x1304   : > { %p2638_p13 = pnand %p4005_p12, %p4004_p10 }
0x1306   : > { %3110 = dma.done.wait (!%p2638_p13), %s2142_s16, 128  }
0x1307   : > { %3112 = vsyncadd (!%p2638_p13), %s2142_s16, 4294967168  ;;  %s2151_s26 = scalar_lea.sflag [#allocation19], %s2141_s5 }
0x1308   : > { %3114 = dma.done.wait (!%p2638_p13), %s2151_s26, 16  }
0x1309   : > { %3116 = vsyncadd (!%p2638_p13), %s2151_s26, 4294967280  ;;  %s4006_s1 = sld [smem:[#allocation28_spill]]  ;;  %s4007_s24 = sld [smem:[#allocation29_spill]] }
0x130a   : > { %p46_p5 = scmp.ge.s32.totalorder %s3469_s29, 4   ;;  %s4008_s4 = smov %s3123_s30 }
0x130b   : > { %s4010_s25 = smov %s3469_s29 }
0x130c   :  { %48 = sbr.rel (!%p46_p5) target bundleno = 33 (0x21), region = 214 }
0x130f   : > { %s4009_s30 = smov %s4006_s1 }
0x1313   :  { %2155 = vsyncpa [#allocation3], 1 }
0x1314   :  { %2157 = vsyncpa [#allocation3 + $0x1], 1 }
0x1315   :  { %2158 = vsyncpa [#allocation6], 1 }
0x1316   :  { %2160 = vsyncpa [#allocation6 + $0x1], 1 }
0x1317   :  { %2161 = vsyncpa [#allocation9], 1 }
0x1318   :  { %2162 = vsyncpa [#allocation12], 1 }
0x1319   :  { %2163 = vsyncpa [#allocation15], 1 }
0x131a   :  { %2164 = vsyncpa [#allocation4], 1 }
0x131b   :  { %2166 = vsyncpa [#allocation4 + $0x1], 1 }
0x131c   :  { %2167 = vsyncpa [#allocation19], 1 }
0x131d   :  { %2169 = vsyncpa [#allocation19 + $0x1], 1 }

</bundles_post_ra>
